<compile_context>
chip_gen: v7x
topology: tpu7x:2x2x1
jax: 0.10.0
libtpu: 0.0.40
codegen_flags: <defaults>
</compile_context>

<pallas_src>
import functools

import jax
import jax.numpy as jnp
from jax.experimental import pallas as pl
from jax.experimental.pallas import tpu as pltpu

C_PAD = 128  # lane-dense slab / classifier width


# ----------------------------------------------------------------------------
# Fused kernel: all views + merge for one batch tile.
# ----------------------------------------------------------------------------
def qmf_fused_kernel(*refs, num_views, num_classes, batch, tile_b):
    """refs layout:
        refs[0]                : y     (TILE_B, 1) int32
        refs[1 + 7v .. 7v+7]   : x_v, w1_v, b1_v, w2_v, b2_v, wc_v, bc_v
        refs[1 + 7V]           : slab  (V+1, TILE_B, C_PAD) f32 output
            slab[v, :, 0:C] = evidence_v ;  slab[v, :, C] = conf_v
            slab[V, :, 0:C] = evidence_merge
        refs[2 + 7V]           : ce    (1, 8, 128) f32 output
            ce[0, 0, v]  = sum over this tile's VALID rows of CE(evidence_v, y)
            ce[0, 0, V]  = same for the merged evidence (all other entries 0)
        refs[3 + 7V]           : merged VMEM scratch (TILE_B, C_PAD) f32
    """
    y_ref = refs[0]
    view_refs = refs[1:1 + 7 * num_views]
    slab_ref = refs[1 + 7 * num_views]
    ce_ref = refs[2 + 7 * num_views]
    merged_ref = refs[3 + 7 * num_views]

    C = num_classes
    width = slab_ref.shape[2]
    neg_inf = jnp.float32(-jnp.inf)

    tile_start = pl.program_id(0) * tile_b
    row = jax.lax.broadcasted_iota(jnp.int32, (tile_b, 1), 0)
    row_valid = (tile_start + row) < batch            # mask padded batch rows

    merged_ref[...] = jnp.zeros_like(merged_ref)
    ce_sums = []

    for v in range(num_views):
        (x_ref, w1_ref, b1_ref, w2_ref, b2_ref, wc_ref, bc_ref) = (
            view_refs[7 * v:7 * v + 7])

        # 2-layer ReLU MLP + padded classifier; bf16 MXU operands, f32 acc.
        h1 = jnp.dot(x_ref[...], w1_ref[...],
                     preferred_element_type=jnp.float32) + b1_ref[...]
        h1 = jnp.maximum(h1, 0.0).astype(jnp.bfloat16)
        h2 = jnp.dot(h1, w2_ref[...],
                     preferred_element_type=jnp.float32) + b2_ref[...]
        h2 = jnp.maximum(h2, 0.0).astype(jnp.bfloat16)
        logits = jnp.dot(h2, wc_ref[...],
                         preferred_element_type=jnp.float32) + bc_ref[...]

        # Masks rebuilt per view from a fresh iota -> nothing big stays live
        # in vregs across the unrolled views.
        col = jax.lax.broadcasted_iota(jnp.int32, (tile_b, width), 1)
        col_mask = col < C
        yoh = (col == y_ref[...]).astype(jnp.float32)   # in-kernel one-hot

        # softplus == torch.nn.Softplus(beta=1, threshold=20)
        ev = jnp.where(logits > 20.0, logits,
                       jnp.log1p(jnp.exp(jnp.minimum(logits, 20.0))))
        ev = jnp.where(col_mask, ev, 0.0)               # zero padded classes

        # energy / confidence — deliberately the reference's unstable form
        # plus the isinf->0 patch, so overflow semantics match torch exactly.
        exp_ev = jnp.where(col_mask, jnp.exp(ev) + 0.001, 0.0)
        energy = jnp.log(jnp.sum(exp_ev, axis=1, keepdims=True))
        energy = jnp.where(jnp.isinf(energy), 0.0, energy)
        conf = energy / 10.0                            # (TILE_B, 1)

        # per-sample cross entropy: logsumexp(ev) - ev[y]  (stable)
        m = jnp.max(jnp.where(col_mask, ev, neg_inf), axis=1, keepdims=True)
        lse = m + jnp.log(jnp.sum(jnp.where(col_mask, jnp.exp(ev - m), 0.0),
                                  axis=1, keepdims=True))
        ce = lse - jnp.sum(ev * yoh, axis=1, keepdims=True)
        ce_sums.append(jnp.sum(jnp.where(row_valid, ce, 0.0)))

        # confidence-weighted merge accumulates in VMEM scratch.
        merged_ref[...] += ev * conf

        # pack a lane-dense (TILE_B, 128) tile: evidence | conf
        slab_ref[v] = ev + jnp.where(col == C, conf, 0.0)

    # cross entropy of the merged evidence.
    merged = merged_ref[...]
    col = jax.lax.broadcasted_iota(jnp.int32, (tile_b, width), 1)
    col_mask = col < C
    yoh = (col == y_ref[...]).astype(jnp.float32)
    mm = jnp.max(jnp.where(col_mask, merged, neg_inf), axis=1, keepdims=True)
    mlse = mm + jnp.log(jnp.sum(jnp.where(col_mask, jnp.exp(merged - mm), 0.0),
                                axis=1, keepdims=True))
    mce = mlse - jnp.sum(merged * yoh, axis=1, keepdims=True)
    ce_sums.append(jnp.sum(jnp.where(row_valid, mce, 0.0)))

    slab_ref[num_views] = merged

    # pack the V+1 per-tile CE sums into row 0 of a lane-dense (8,128) tile.
    r8 = jax.lax.broadcasted_iota(jnp.int32, (8, 128), 0)
    c8 = jax.lax.broadcasted_iota(jnp.int32, (8, 128), 1)
    ce_tile = jnp.zeros((8, 128), jnp.float32)
    for slot, s in enumerate(ce_sums):
        ce_tile = ce_tile + jnp.where((r8 == 0) & (c8 == slot), s, 0.0)
    ce_ref[0] = ce_tile


# ----------------------------------------------------------------------------
# Wrapper
# ----------------------------------------------------------------------------
def _round_up(x, m):
    return (x + m - 1) // m * m


def _choose_tile_b(b):
    # Cap raised to 256 (fills the 256-wide MXU on v6e/v7x, amortizes the
    # ~0.35 us per-grid-step overhead) while aiming for >= 2 tiles so the
    # "parallel" batch axis can shard across both v7x TensorCores.  Rows must
    # be a multiple of 8 (sublane constraint).
    half = _round_up(max(1, (b + 1) // 2), 8)
    return max(8, min(256, half))


def prepare_qmf_params(params, num_classes):
    """One-time prep: bf16 MLP weights, classifier zero-padded to C_PAD lanes.

    Hoisted out of the per-call wrapper so no cast/pad HBM passes happen on
    every forward call.
    """
    prepared = []
    for p in params:
        (w1, b1), (w2, b2) = p["mlp"]
        wc, bc = p["wc"], p["bc"]
        h2 = w2.shape[1]
        wc_p = (jnp.zeros((h2, C_PAD), jnp.float32)
                .at[:, :num_classes].set(wc).astype(jnp.bfloat16))
        bc_p = jnp.zeros((1, C_PAD), jnp.float32).at[:, :num_classes].set(bc)
        prepared.append({
            "w1": w1.astype(jnp.bfloat16), "b1": b1.astype(jnp.float32),
            "w2": w2.astype(jnp.bfloat16), "b2": b2.astype(jnp.float32),
            "wc": wc_p, "bc": bc_p,
        })
    return prepared


@functools.partial(jax.jit, static_argnames=("num_classes",))
def qmf_forward(prepared_params, X, y, num_classes):
    """Mirrors QMF.forward: returns (evidence, evidence_merge, clf_loss, conf).

    `prepared_params` must come from prepare_qmf_params().
    """
    V = len(X)
    B = y.shape[0]
    C = num_classes
    assert C + 1 <= C_PAD, "num_classes must fit the packed 128-wide slab"

    tile_b = _choose_tile_b(B)
    b_pad = _round_up(B, tile_b)
    n_tiles = b_pad // tile_b

    # labels -> (B_pad, 1) int32 (one-hot built in-kernel); pad only if needed.
    y2 = y.astype(jnp.int32).reshape(-1, 1)
    if b_pad != B:
        y2 = jnp.pad(y2, ((0, b_pad - B), (0, 0)))

    args = [y2]
    in_specs = [pl.BlockSpec((tile_b, 1), lambda i: (i, 0))]

    for v in range(V):
        x = X[v]
        d_in = x.shape[1]
        xb = x.astype(jnp.bfloat16)
        if b_pad != B:                       # skip the pad copy when aligned
            xb = jnp.pad(xb, ((0, b_pad - B), (0, 0)))
        p = prepared_params[v]
        h1, h2 = p["w1"].shape[1], p["w2"].shape[1]

        args += [xb, p["w1"], p["b1"], p["w2"], p["b2"], p["wc"], p["bc"]]
        in_specs += [
            pl.BlockSpec((tile_b, d_in), lambda i: (i, 0)),   # x: batch-tiled
            pl.BlockSpec((d_in, h1), lambda i: (0, 0)),       # weights resident
            pl.BlockSpec((1, h1), lambda i: (0, 0)),
            pl.BlockSpec((h1, h2), lambda i: (0, 0)),
            pl.BlockSpec((1, h2), lambda i: (0, 0)),
            pl.BlockSpec((h2, C_PAD), lambda i: (0, 0)),
            pl.BlockSpec((1, C_PAD), lambda i: (0, 0)),
        ]

    kernel = functools.partial(qmf_fused_kernel, num_views=V, num_classes=C,
                               batch=B, tile_b=tile_b)
    slab, ce_out = pl.pallas_call(
        kernel,
        grid=(n_tiles,),
        in_specs=in_specs,
        out_specs=(
            pl.BlockSpec((V + 1, tile_b, C_PAD), lambda i: (0, i, 0)),
            pl.BlockSpec((1, 8, 128), lambda i: (i, 0, 0)),
        ),
        out_shape=(
            jax.ShapeDtypeStruct((V + 1, b_pad, C_PAD), jnp.float32),
            jax.ShapeDtypeStruct((n_tiles, 8, 128), jnp.float32),
        ),
        scratch_shapes=[pltpu.VMEM((tile_b, C_PAD), jnp.float32)],
        compiler_params=pltpu.CompilerParams(
            dimension_semantics=("parallel",),
            vmem_limit_bytes=32 * 1024 * 1024),
    )(*args)

    evidence = {v: slab[v, :B, :C] for v in range(V)}
    conf = {v: slab[v, :B, C:C + 1] for v in range(V)}
    evidence_merge = slab[V, :B, :C]
    # ce_out is zero everywhere except the V+1 per-tile CE sums -> one reduce.
    clf_loss = jnp.sum(ce_out) / B
    return evidence, evidence_merge, clf_loss, conf


# ----------------------------------------------------------------------------
# PyTorch-style parameter init (uniform +/- 1/sqrt(fan_in))
# ----------------------------------------------------------------------------
def init_qmf_params(key, in_dim, num_classes, encode_dim=(128, 256)):
    params = []
    for d_in in in_dim:
        key, *ks = jax.random.split(key, 7)
        dims = [d_in] + list(encode_dim)
        layers = []
        for li in range(len(encode_dim)):
            fan_in = dims[li]
            k = 1.0 / jnp.sqrt(fan_in)
            w = jax.random.uniform(ks[2 * li], (dims[li], dims[li + 1]),
                                   jnp.float32, -k, k)
            b = jax.random.uniform(ks[2 * li + 1], (1, dims[li + 1]),
                                   jnp.float32, -k, k)
            layers.append((w, b))
        fan_in = encode_dim[-1]
        k = 1.0 / jnp.sqrt(fan_in)
        wc = jax.random.uniform(ks[4], (encode_dim[-1], num_classes),
                                jnp.float32, -k, k)
        bc = jax.random.uniform(ks[5], (1, num_classes), jnp.float32, -k, k)
        params.append({"mlp": layers, "wc": wc, "bc": bc})
    return params


# ----------------------------------------------------------------------------
if __name__ == "__main__":
    key = jax.random.PRNGKey(0)

    in_dim = [32, 48]          # two views, different input dims
    num_classes = 8
    batch = 8
    encode_dim = (128, 256)

    kp, kx0, kx1, ky = jax.random.split(key, 4)
    params = init_qmf_params(kp, in_dim, num_classes, encode_dim)
    prepared = prepare_qmf_params(params, num_classes)   # one-time weight prep

    X = [
        jax.random.normal(kx0, (batch, in_dim[0]), jnp.float32),
        jax.random.normal(kx1, (batch, in_dim[1]), jnp.float32),
    ]
    y = jax.random.randint(ky, (batch,), 0, num_classes)

    evidence, evidence_merge, clf_loss, conf = qmf_forward(
        prepared, X, y, num_classes=num_classes)
    jax.block_until_ready((evidence, evidence_merge, clf_loss, conf))

    assert evidence[0].shape == (batch, num_classes)
    assert evidence[1].shape == (batch, num_classes)
    assert evidence_merge.shape == (batch, num_classes)
    assert conf[0].shape == (batch, 1)
    assert clf_loss.shape == ()
    assert bool(jnp.isfinite(clf_loss))
    assert bool(jnp.all(jnp.isfinite(evidence_merge)))
    print("KERNEL_OK")
</pallas_src>

<mosaic_0001>
module attributes {stable_mosaic.version = 11 : i64} {
  func.func @qmf_fused_kernel(%arg0: i32, %arg1: memref<8x1xi32, #tpu.memory_space<vmem>>, %arg2: memref<8x32xbf16, #tpu.memory_space<vmem>>, %arg3: memref<32x128xbf16, #tpu.memory_space<vmem>>, %arg4: memref<1x128xf32, #tpu.memory_space<vmem>>, %arg5: memref<128x256xbf16, #tpu.memory_space<vmem>>, %arg6: memref<1x256xf32, #tpu.memory_space<vmem>>, %arg7: memref<256x128xbf16, #tpu.memory_space<vmem>>, %arg8: memref<1x128xf32, #tpu.memory_space<vmem>>, %arg9: memref<8x48xbf16, #tpu.memory_space<vmem>>, %arg10: memref<48x128xbf16, #tpu.memory_space<vmem>>, %arg11: memref<1x128xf32, #tpu.memory_space<vmem>>, %arg12: memref<128x256xbf16, #tpu.memory_space<vmem>>, %arg13: memref<1x256xf32, #tpu.memory_space<vmem>>, %arg14: memref<256x128xbf16, #tpu.memory_space<vmem>>, %arg15: memref<1x128xf32, #tpu.memory_space<vmem>>, %arg16: memref<3x8x128xf32, #tpu.memory_space<vmem>>, %arg17: memref<1x8x128xf32, #tpu.memory_space<vmem>>, %arg18: memref<8x128xf32, #tpu.memory_space<vmem>>) attributes {dimension_semantics = [#tpu.dimension_semantics<parallel>], iteration_bounds = array<i64: 1>, scalar_prefetch = 0 : i64, scratch_operands = 1 : i64, tpu.core_type = #tpu.core_type<tc>, window_params = [{transform_indices = @transform_0, window_bounds = array<i64: 8, 1>}, {transform_indices = @transform_1, window_bounds = array<i64: 8, 32>}, {pipeline_mode = #tpu.pipeline_mode<synchronous>, transform_indices = @transform_2, window_bounds = array<i64: 32, 128>}, {pipeline_mode = #tpu.pipeline_mode<synchronous>, transform_indices = @transform_3, window_bounds = array<i64: 1, 128>}, {pipeline_mode = #tpu.pipeline_mode<synchronous>, transform_indices = @transform_4, window_bounds = array<i64: 128, 256>}, {pipeline_mode = #tpu.pipeline_mode<synchronous>, transform_indices = @transform_5, window_bounds = array<i64: 1, 256>}, {pipeline_mode = #tpu.pipeline_mode<synchronous>, transform_indices = @transform_6, window_bounds = array<i64: 256, 128>}, {pipeline_mode = #tpu.pipeline_mode<synchronous>, transform_indices = @transform_7, window_bounds = array<i64: 1, 128>}, {transform_indices = @transform_8, window_bounds = array<i64: 8, 48>}, {pipeline_mode = #tpu.pipeline_mode<synchronous>, transform_indices = @transform_9, window_bounds = array<i64: 48, 128>}, {pipeline_mode = #tpu.pipeline_mode<synchronous>, transform_indices = @transform_10, window_bounds = array<i64: 1, 128>}, {pipeline_mode = #tpu.pipeline_mode<synchronous>, transform_indices = @transform_11, window_bounds = array<i64: 128, 256>}, {pipeline_mode = #tpu.pipeline_mode<synchronous>, transform_indices = @transform_12, window_bounds = array<i64: 1, 256>}, {pipeline_mode = #tpu.pipeline_mode<synchronous>, transform_indices = @transform_13, window_bounds = array<i64: 256, 128>}, {pipeline_mode = #tpu.pipeline_mode<synchronous>, transform_indices = @transform_14, window_bounds = array<i64: 1, 128>}, {transform_indices = @transform_15, window_bounds = array<i64: 3, 8, 128>}, {transform_indices = @transform_16, window_bounds = array<i64: 1, 8, 128>}]} {
    %c8_i32 = arith.constant 8 : i32
    %0 = arith.muli %arg0, %c8_i32 : i32
    %1 = tpu.iota {dimensions = array<i32: 0>} : vector<8x1xi32>
    %2 = vector.broadcast %0 : i32 to vector<8x1xi32>
    %3 = arith.addi %2, %1 : vector<8x1xi32>
    %c8_i32_0 = arith.constant 8 : i32
    %4 = vector.broadcast %c8_i32_0 : i32 to vector<8x1xi32>
    %5 = arith.cmpi slt, %3, %4 : vector<8x1xi32>
    %cst = arith.constant 0.000000e+00 : f32
    %6 = vector.broadcast %cst : f32 to vector<8x128xf32>
    %c0 = arith.constant 0 : index
    %c0_1 = arith.constant 0 : index
    %7 = vector.load %arg18[%c0, %c0_1] : memref<8x128xf32, #tpu.memory_space<vmem>>, vector<8x128xf32>
    tpu.vector_store %arg18[%c0, %c0_1], %6 {strides = array<i32>} : memref<8x128xf32, #tpu.memory_space<vmem>>, vector<8x128xf32>,
    %c0_2 = arith.constant 0 : index
    %c0_3 = arith.constant 0 : index
    %8 = vector.load %arg2[%c0_2, %c0_3] : memref<8x32xbf16, #tpu.memory_space<vmem>>, vector<8x32xbf16>
    %c0_4 = arith.constant 0 : index
    %c0_5 = arith.constant 0 : index
    %9 = vector.load %arg3[%c0_4, %c0_5] : memref<32x128xbf16, #tpu.memory_space<vmem>>, vector<32x128xbf16>
    %cst_6 = arith.constant dense<0.000000e+00> : vector<8x128xf32>
    %10 = tpu.matmul %8, %9, %cst_6 {dimension_numbers = #tpu.dot_dimension_numbers<[1], [0], [0], [1], [0, 0, 1, 1], [], []>} : vector<8x32xbf16>, vector<32x128xbf16>, vector<8x128xf32> -> vector<8x128xf32>
    %c0_7 = arith.constant 0 : index
    %c0_8 = arith.constant 0 : index
    %11 = vector.load %arg4[%c0_7, %c0_8] : memref<1x128xf32, #tpu.memory_space<vmem>>, vector<1x128xf32>
    %12 = vector.broadcast %11 : vector<1x128xf32> to vector<8x128xf32>
    %13 = arith.addf %10, %12 : vector<8x128xf32>
    %cst_9 = arith.constant 0.000000e+00 : f32
    %14 = vector.broadcast %cst_9 : f32 to vector<8x128xf32>
    %15 = arith.maximumf %13, %14 : vector<8x128xf32>
    %16 = arith.truncf %15 : vector<8x128xf32> to vector<8x128xbf16>
    %c0_10 = arith.constant 0 : index
    %c0_11 = arith.constant 0 : index
    %17 = vector.load %arg5[%c0_10, %c0_11] : memref<128x256xbf16, #tpu.memory_space<vmem>>, vector<128x256xbf16>
    %cst_12 = arith.constant dense<0.000000e+00> : vector<8x256xf32>
    %18 = tpu.matmul %16, %17, %cst_12 {dimension_numbers = #tpu.dot_dimension_numbers<[1], [0], [0], [1], [0, 0, 1, 1], [], []>} : vector<8x128xbf16>, vector<128x256xbf16>, vector<8x256xf32> -> vector<8x256xf32>
    %c0_13 = arith.constant 0 : index
    %c0_14 = arith.constant 0 : index
    %19 = vector.load %arg6[%c0_13, %c0_14] : memref<1x256xf32, #tpu.memory_space<vmem>>, vector<1x256xf32>
    %20 = vector.broadcast %19 : vector<1x256xf32> to vector<8x256xf32>
    %21 = arith.addf %18, %20 : vector<8x256xf32>
    %cst_15 = arith.constant 0.000000e+00 : f32
    %22 = vector.broadcast %cst_15 : f32 to vector<8x256xf32>
    %23 = arith.maximumf %21, %22 : vector<8x256xf32>
    %24 = arith.truncf %23 : vector<8x256xf32> to vector<8x256xbf16>
    %c0_16 = arith.constant 0 : index
    %c0_17 = arith.constant 0 : index
    %25 = vector.load %arg7[%c0_16, %c0_17] : memref<256x128xbf16, #tpu.memory_space<vmem>>, vector<256x128xbf16>
    %cst_18 = arith.constant dense<0.000000e+00> : vector<8x128xf32>
    %26 = tpu.matmul %24, %25, %cst_18 {dimension_numbers = #tpu.dot_dimension_numbers<[1], [0], [0], [1], [0, 0, 1, 1], [], []>} : vector<8x256xbf16>, vector<256x128xbf16>, vector<8x128xf32> -> vector<8x128xf32>
    %c0_19 = arith.constant 0 : index
    %c0_20 = arith.constant 0 : index
    %27 = vector.load %arg8[%c0_19, %c0_20] : memref<1x128xf32, #tpu.memory_space<vmem>>, vector<1x128xf32>
    %28 = vector.broadcast %27 : vector<1x128xf32> to vector<8x128xf32>
    %29 = arith.addf %26, %28 : vector<8x128xf32>
    %30 = tpu.iota {dimensions = array<i32: 1>} : vector<8x128xi32>
    %c8_i32_21 = arith.constant 8 : i32
    %31 = vector.broadcast %c8_i32_21 : i32 to vector<8x128xi32>
    %32 = arith.cmpi slt, %30, %31 : vector<8x128xi32>
    %c0_22 = arith.constant 0 : index
    %c0_23 = arith.constant 0 : index
    %33 = vector.load %arg1[%c0_22, %c0_23] : memref<8x1xi32, #tpu.memory_space<vmem>>, vector<8x1xi32>
    %34 = vector.broadcast %33 : vector<8x1xi32> to vector<8x128xi32>
    %35 = arith.cmpi eq, %30, %34 : vector<8x128xi32>
    %36 = arith.extui %35 : vector<8x128xi1> to vector<8x128xi32>
    %37 = arith.sitofp %36 : vector<8x128xi32> to vector<8x128xf32>
    %cst_24 = arith.constant 2.000000e+01 : f32
    %38 = vector.broadcast %cst_24 : f32 to vector<8x128xf32>
    %39 = arith.cmpf ogt, %29, %38 : vector<8x128xf32>
    %cst_25 = arith.constant 2.000000e+01 : f32
    %40 = vector.broadcast %cst_25 : f32 to vector<8x128xf32>
    %41 = arith.minimumf %29, %40 : vector<8x128xf32>
    %42 = math.exp %41 : vector<8x128xf32>
    %43 = math.log1p %42 : vector<8x128xf32>
    %44 = arith.select %39, %29, %43 : vector<8x128xi1>, vector<8x128xf32>
    %cst_26 = arith.constant 0.000000e+00 : f32
    %45 = vector.broadcast %cst_26 : f32 to vector<8x128xf32>
    %46 = arith.select %32, %44, %45 : vector<8x128xi1>, vector<8x128xf32>
    %47 = math.exp %46 : vector<8x128xf32>
    %cst_27 = arith.constant 1.000000e-03 : f32
    %48 = vector.broadcast %cst_27 : f32 to vector<8x128xf32>
    %49 = arith.addf %47, %48 : vector<8x128xf32>
    %cst_28 = arith.constant 0.000000e+00 : f32
    %50 = vector.broadcast %cst_28 : f32 to vector<8x128xf32>
    %51 = arith.select %32, %49, %50 : vector<8x128xi1>, vector<8x128xf32>
    %cst_29 = arith.constant dense<0.000000e+00> : vector<8xf32>
    %52 = vector.multi_reduction <add>, %51, %cst_29 [1] : vector<8x128xf32> to vector<8xf32>
    %53 = vector.shape_cast %52 : vector<8xf32> to vector<8x1xf32>
    %54 = math.log %53 : vector<8x1xf32>
    %55 = math.absf %54 : vector<8x1xf32>
    %cst_30 = arith.constant 0x7F800000 : f32
    %56 = vector.broadcast %cst_30 : f32 to vector<8x1xf32>
    %57 = arith.cmpf oeq, %55, %56 : vector<8x1xf32>
    %cst_31 = arith.constant 0.000000e+00 : f32
    %58 = vector.broadcast %cst_31 : f32 to vector<8x1xf32>
    %59 = arith.select %57, %58, %54 : vector<8x1xi1>, vector<8x1xf32>
    %cst_32 = arith.constant 1.000000e+01 : f32
    %60 = vector.broadcast %cst_32 : f32 to vector<8x1xf32>
    %61 = arith.divf %59, %60 : vector<8x1xf32>
    %cst_33 = arith.constant 0xFF800000 : f32
    %62 = vector.broadcast %cst_33 : f32 to vector<8x128xf32>
    %63 = arith.select %32, %46, %62 : vector<8x128xi1>, vector<8x128xf32>
    %cst_34 = arith.constant dense<0xFF800000> : vector<8xf32>
    %64 = vector.multi_reduction <maximumf>, %63, %cst_34 [1] : vector<8x128xf32> to vector<8xf32>
    %65 = vector.shape_cast %64 : vector<8xf32> to vector<8x1xf32>
    %66 = vector.broadcast %65 : vector<8x1xf32> to vector<8x128xf32>
    %67 = arith.subf %46, %66 : vector<8x128xf32>
    %68 = math.exp %67 : vector<8x128xf32>
    %cst_35 = arith.constant 0.000000e+00 : f32
    %69 = vector.broadcast %cst_35 : f32 to vector<8x128xf32>
    %70 = arith.select %32, %68, %69 : vector<8x128xi1>, vector<8x128xf32>
    %cst_36 = arith.constant dense<0.000000e+00> : vector<8xf32>
    %71 = vector.multi_reduction <add>, %70, %cst_36 [1] : vector<8x128xf32> to vector<8xf32>
    %72 = vector.shape_cast %71 : vector<8xf32> to vector<8x1xf32>
    %73 = math.log %72 : vector<8x1xf32>
    %74 = arith.addf %65, %73 : vector<8x1xf32>
    %75 = arith.mulf %46, %37 : vector<8x128xf32>
    %cst_37 = arith.constant dense<0.000000e+00> : vector<8xf32>
    %76 = vector.multi_reduction <add>, %75, %cst_37 [1] : vector<8x128xf32> to vector<8xf32>
    %77 = vector.shape_cast %76 : vector<8xf32> to vector<8x1xf32>
    %78 = arith.subf %74, %77 : vector<8x1xf32>
    %cst_38 = arith.constant 0.000000e+00 : f32
    %79 = vector.broadcast %cst_38 : f32 to vector<8x1xf32>
    %80 = arith.select %5, %78, %79 : vector<8x1xi1>, vector<8x1xf32>
    %81 = vector.shape_cast %80 : vector<8x1xf32> to vector<1x8x1xf32>
    %cst_39 = arith.constant dense<0.000000e+00> : vector<1xf32>
    %82 = vector.multi_reduction <add>, %81, %cst_39 [1, 2] : vector<1x8x1xf32> to vector<1xf32>
    %83 = vector.shape_cast %82 : vector<1xf32> to vector<1x1x1xf32>
    %84 = vector.extract %83[0, 0, 0] : f32 from vector<1x1x1xf32>
    %c0_40 = arith.constant 0 : index
    %c0_41 = arith.constant 0 : index
    %85 = vector.load %arg18[%c0_40, %c0_41] : memref<8x128xf32, #tpu.memory_space<vmem>>, vector<8x128xf32>
    %86 = vector.broadcast %61 : vector<8x1xf32> to vector<8x128xf32>
    %87 = arith.mulf %46, %86 : vector<8x128xf32>
    %88 = arith.addf %85, %87 : vector<8x128xf32>
    %c0_42 = arith.constant 0 : index
    %c0_43 = arith.constant 0 : index
    %89 = vector.load %arg18[%c0_42, %c0_43] : memref<8x128xf32, #tpu.memory_space<vmem>>, vector<8x128xf32>
    tpu.vector_store %arg18[%c0_42, %c0_43], %88 {strides = array<i32>} : memref<8x128xf32, #tpu.memory_space<vmem>>, vector<8x128xf32>,
    %c8_i32_44 = arith.constant 8 : i32
    %90 = vector.broadcast %c8_i32_44 : i32 to vector<8x128xi32>
    %91 = arith.cmpi eq, %30, %90 : vector<8x128xi32>
    %cst_45 = arith.constant 0.000000e+00 : f32
    %92 = vector.shape_cast %61 : vector<8x1xf32> to vector<8x1xf32>
    %93 = vector.broadcast %92 : vector<8x1xf32> to vector<8x128xf32>
    %94 = vector.broadcast %cst_45 : f32 to vector<8x128xf32>
    %95 = arith.select %91, %93, %94 : vector<8x128xi1>, vector<8x128xf32>
    %96 = arith.addf %46, %95 : vector<8x128xf32>
    %c0_46 = arith.constant 0 : index
    %c0_47 = arith.constant 0 : index
    %c0_48 = arith.constant 0 : index
    %97 = vector.load %arg16[%c0_46, %c0_47, %c0_48] : memref<3x8x128xf32, #tpu.memory_space<vmem>>, vector<1x8x128xf32>
    %98 = vector.shape_cast %97 : vector<1x8x128xf32> to vector<8x128xf32>
    %99 = vector.shape_cast %96 : vector<8x128xf32> to vector<1x8x128xf32>
    tpu.vector_store %arg16[%c0_46, %c0_47, %c0_48], %99 {strides = array<i32>} : memref<3x8x128xf32, #tpu.memory_space<vmem>>, vector<1x8x128xf32>,
    %c0_49 = arith.constant 0 : index
    %c0_50 = arith.constant 0 : index
    %100 = vector.load %arg9[%c0_49, %c0_50] : memref<8x48xbf16, #tpu.memory_space<vmem>>, vector<8x48xbf16>
    %c0_51 = arith.constant 0 : index
    %c0_52 = arith.constant 0 : index
    %101 = vector.load %arg10[%c0_51, %c0_52] : memref<48x128xbf16, #tpu.memory_space<vmem>>, vector<48x128xbf16>
    %cst_53 = arith.constant dense<0.000000e+00> : vector<8x128xf32>
    %102 = tpu.matmul %100, %101, %cst_53 {dimension_numbers = #tpu.dot_dimension_numbers<[1], [0], [0], [1], [0, 0, 1, 1], [], []>} : vector<8x48xbf16>, vector<48x128xbf16>, vector<8x128xf32> -> vector<8x128xf32>
    %c0_54 = arith.constant 0 : index
    %c0_55 = arith.constant 0 : index
    %103 = vector.load %arg11[%c0_54, %c0_55] : memref<1x128xf32, #tpu.memory_space<vmem>>, vector<1x128xf32>
    %104 = vector.broadcast %103 : vector<1x128xf32> to vector<8x128xf32>
    %105 = arith.addf %102, %104 : vector<8x128xf32>
    %cst_56 = arith.constant 0.000000e+00 : f32
    %106 = vector.broadcast %cst_56 : f32 to vector<8x128xf32>
    %107 = arith.maximumf %105, %106 : vector<8x128xf32>
    %108 = arith.truncf %107 : vector<8x128xf32> to vector<8x128xbf16>
    %c0_57 = arith.constant 0 : index
    %c0_58 = arith.constant 0 : index
    %109 = vector.load %arg12[%c0_57, %c0_58] : memref<128x256xbf16, #tpu.memory_space<vmem>>, vector<128x256xbf16>
    %cst_59 = arith.constant dense<0.000000e+00> : vector<8x256xf32>
    %110 = tpu.matmul %108, %109, %cst_59 {dimension_numbers = #tpu.dot_dimension_numbers<[1], [0], [0], [1], [0, 0, 1, 1], [], []>} : vector<8x128xbf16>, vector<128x256xbf16>, vector<8x256xf32> -> vector<8x256xf32>
    %c0_60 = arith.constant 0 : index
    %c0_61 = arith.constant 0 : index
    %111 = vector.load %arg13[%c0_60, %c0_61] : memref<1x256xf32, #tpu.memory_space<vmem>>, vector<1x256xf32>
    %112 = vector.broadcast %111 : vector<1x256xf32> to vector<8x256xf32>
    %113 = arith.addf %110, %112 : vector<8x256xf32>
    %cst_62 = arith.constant 0.000000e+00 : f32
    %114 = vector.broadcast %cst_62 : f32 to vector<8x256xf32>
    %115 = arith.maximumf %113, %114 : vector<8x256xf32>
    %116 = arith.truncf %115 : vector<8x256xf32> to vector<8x256xbf16>
    %c0_63 = arith.constant 0 : index
    %c0_64 = arith.constant 0 : index
    %117 = vector.load %arg14[%c0_63, %c0_64] : memref<256x128xbf16, #tpu.memory_space<vmem>>, vector<256x128xbf16>
    %cst_65 = arith.constant dense<0.000000e+00> : vector<8x128xf32>
    %118 = tpu.matmul %116, %117, %cst_65 {dimension_numbers = #tpu.dot_dimension_numbers<[1], [0], [0], [1], [0, 0, 1, 1], [], []>} : vector<8x256xbf16>, vector<256x128xbf16>, vector<8x128xf32> -> vector<8x128xf32>
    %c0_66 = arith.constant 0 : index
    %c0_67 = arith.constant 0 : index
    %119 = vector.load %arg15[%c0_66, %c0_67] : memref<1x128xf32, #tpu.memory_space<vmem>>, vector<1x128xf32>
    %120 = vector.broadcast %119 : vector<1x128xf32> to vector<8x128xf32>
    %121 = arith.addf %118, %120 : vector<8x128xf32>
    %122 = tpu.iota {dimensions = array<i32: 1>} : vector<8x128xi32>
    %c8_i32_68 = arith.constant 8 : i32
    %123 = vector.broadcast %c8_i32_68 : i32 to vector<8x128xi32>
    %124 = arith.cmpi slt, %122, %123 : vector<8x128xi32>
    %c0_69 = arith.constant 0 : index
    %c0_70 = arith.constant 0 : index
    %125 = vector.load %arg1[%c0_69, %c0_70] : memref<8x1xi32, #tpu.memory_space<vmem>>, vector<8x1xi32>
    %126 = vector.broadcast %125 : vector<8x1xi32> to vector<8x128xi32>
    %127 = arith.cmpi eq, %122, %126 : vector<8x128xi32>
    %128 = arith.extui %127 : vector<8x128xi1> to vector<8x128xi32>
    %129 = arith.sitofp %128 : vector<8x128xi32> to vector<8x128xf32>
    %cst_71 = arith.constant 2.000000e+01 : f32
    %130 = vector.broadcast %cst_71 : f32 to vector<8x128xf32>
    %131 = arith.cmpf ogt, %121, %130 : vector<8x128xf32>
    %cst_72 = arith.constant 2.000000e+01 : f32
    %132 = vector.broadcast %cst_72 : f32 to vector<8x128xf32>
    %133 = arith.minimumf %121, %132 : vector<8x128xf32>
    %134 = math.exp %133 : vector<8x128xf32>
    %135 = math.log1p %134 : vector<8x128xf32>
    %136 = arith.select %131, %121, %135 : vector<8x128xi1>, vector<8x128xf32>
    %cst_73 = arith.constant 0.000000e+00 : f32
    %137 = vector.broadcast %cst_73 : f32 to vector<8x128xf32>
    %138 = arith.select %124, %136, %137 : vector<8x128xi1>, vector<8x128xf32>
    %139 = math.exp %138 : vector<8x128xf32>
    %cst_74 = arith.constant 1.000000e-03 : f32
    %140 = vector.broadcast %cst_74 : f32 to vector<8x128xf32>
    %141 = arith.addf %139, %140 : vector<8x128xf32>
    %cst_75 = arith.constant 0.000000e+00 : f32
    %142 = vector.broadcast %cst_75 : f32 to vector<8x128xf32>
    %143 = arith.select %124, %141, %142 : vector<8x128xi1>, vector<8x128xf32>
    %cst_76 = arith.constant dense<0.000000e+00> : vector<8xf32>
    %144 = vector.multi_reduction <add>, %143, %cst_76 [1] : vector<8x128xf32> to vector<8xf32>
    %145 = vector.shape_cast %144 : vector<8xf32> to vector<8x1xf32>
    %146 = math.log %145 : vector<8x1xf32>
    %147 = math.absf %146 : vector<8x1xf32>
    %cst_77 = arith.constant 0x7F800000 : f32
    %148 = vector.broadcast %cst_77 : f32 to vector<8x1xf32>
    %149 = arith.cmpf oeq, %147, %148 : vector<8x1xf32>
    %cst_78 = arith.constant 0.000000e+00 : f32
    %150 = vector.broadcast %cst_78 : f32 to vector<8x1xf32>
    %151 = arith.select %149, %150, %146 : vector<8x1xi1>, vector<8x1xf32>
    %cst_79 = arith.constant 1.000000e+01 : f32
    %152 = vector.broadcast %cst_79 : f32 to vector<8x1xf32>
    %153 = arith.divf %151, %152 : vector<8x1xf32>
    %cst_80 = arith.constant 0xFF800000 : f32
    %154 = vector.broadcast %cst_80 : f32 to vector<8x128xf32>
    %155 = arith.select %124, %138, %154 : vector<8x128xi1>, vector<8x128xf32>
    %cst_81 = arith.constant dense<0xFF800000> : vector<8xf32>
    %156 = vector.multi_reduction <maximumf>, %155, %cst_81 [1] : vector<8x128xf32> to vector<8xf32>
    %157 = vector.shape_cast %156 : vector<8xf32> to vector<8x1xf32>
    %158 = vector.broadcast %157 : vector<8x1xf32> to vector<8x128xf32>
    %159 = arith.subf %138, %158 : vector<8x128xf32>
    %160 = math.exp %159 : vector<8x128xf32>
    %cst_82 = arith.constant 0.000000e+00 : f32
    %161 = vector.broadcast %cst_82 : f32 to vector<8x128xf32>
    %162 = arith.select %124, %160, %161 : vector<8x128xi1>, vector<8x128xf32>
    %cst_83 = arith.constant dense<0.000000e+00> : vector<8xf32>
    %163 = vector.multi_reduction <add>, %162, %cst_83 [1] : vector<8x128xf32> to vector<8xf32>
    %164 = vector.shape_cast %163 : vector<8xf32> to vector<8x1xf32>
    %165 = math.log %164 : vector<8x1xf32>
    %166 = arith.addf %157, %165 : vector<8x1xf32>
    %167 = arith.mulf %138, %129 : vector<8x128xf32>
    %cst_84 = arith.constant dense<0.000000e+00> : vector<8xf32>
    %168 = vector.multi_reduction <add>, %167, %cst_84 [1] : vector<8x128xf32> to vector<8xf32>
    %169 = vector.shape_cast %168 : vector<8xf32> to vector<8x1xf32>
    %170 = arith.subf %166, %169 : vector<8x1xf32>
    %cst_85 = arith.constant 0.000000e+00 : f32
    %171 = vector.broadcast %cst_85 : f32 to vector<8x1xf32>
    %172 = arith.select %5, %170, %171 : vector<8x1xi1>, vector<8x1xf32>
    %173 = vector.shape_cast %172 : vector<8x1xf32> to vector<1x8x1xf32>
    %cst_86 = arith.constant dense<0.000000e+00> : vector<1xf32>
    %174 = vector.multi_reduction <add>, %173, %cst_86 [1, 2] : vector<1x8x1xf32> to vector<1xf32>
    %175 = vector.shape_cast %174 : vector<1xf32> to vector<1x1x1xf32>
    %176 = vector.extract %175[0, 0, 0] : f32 from vector<1x1x1xf32>
    %c0_87 = arith.constant 0 : index
    %c0_88 = arith.constant 0 : index
    %177 = vector.load %arg18[%c0_87, %c0_88] : memref<8x128xf32, #tpu.memory_space<vmem>>, vector<8x128xf32>
    %178 = vector.broadcast %153 : vector<8x1xf32> to vector<8x128xf32>
    %179 = arith.mulf %138, %178 : vector<8x128xf32>
    %180 = arith.addf %177, %179 : vector<8x128xf32>
    %c0_89 = arith.constant 0 : index
    %c0_90 = arith.constant 0 : index
    %181 = vector.load %arg18[%c0_89, %c0_90] : memref<8x128xf32, #tpu.memory_space<vmem>>, vector<8x128xf32>
    tpu.vector_store %arg18[%c0_89, %c0_90], %180 {strides = array<i32>} : memref<8x128xf32, #tpu.memory_space<vmem>>, vector<8x128xf32>,
    %c8_i32_91 = arith.constant 8 : i32
    %182 = vector.broadcast %c8_i32_91 : i32 to vector<8x128xi32>
    %183 = arith.cmpi eq, %122, %182 : vector<8x128xi32>
    %cst_92 = arith.constant 0.000000e+00 : f32
    %184 = vector.shape_cast %153 : vector<8x1xf32> to vector<8x1xf32>
    %185 = vector.broadcast %184 : vector<8x1xf32> to vector<8x128xf32>
    %186 = vector.broadcast %cst_92 : f32 to vector<8x128xf32>
    %187 = arith.select %183, %185, %186 : vector<8x128xi1>, vector<8x128xf32>
    %188 = arith.addf %138, %187 : vector<8x128xf32>
    %c1 = arith.constant 1 : index
    %c0_93 = arith.constant 0 : index
    %c0_94 = arith.constant 0 : index
    %189 = vector.load %arg16[%c1, %c0_93, %c0_94] : memref<3x8x128xf32, #tpu.memory_space<vmem>>, vector<1x8x128xf32>
    %190 = vector.shape_cast %189 : vector<1x8x128xf32> to vector<8x128xf32>
    %191 = vector.shape_cast %188 : vector<8x128xf32> to vector<1x8x128xf32>
    tpu.vector_store %arg16[%c1, %c0_93, %c0_94], %191 {strides = array<i32>} : memref<3x8x128xf32, #tpu.memory_space<vmem>>, vector<1x8x128xf32>,
    %c0_95 = arith.constant 0 : index
    %c0_96 = arith.constant 0 : index
    %192 = vector.load %arg18[%c0_95, %c0_96] : memref<8x128xf32, #tpu.memory_space<vmem>>, vector<8x128xf32>
    %193 = tpu.iota {dimensions = array<i32: 1>} : vector<8x128xi32>
    %c8_i32_97 = arith.constant 8 : i32
    %194 = vector.broadcast %c8_i32_97 : i32 to vector<8x128xi32>
    %195 = arith.cmpi slt, %193, %194 : vector<8x128xi32>
    %c0_98 = arith.constant 0 : index
    %c0_99 = arith.constant 0 : index
    %196 = vector.load %arg1[%c0_98, %c0_99] : memref<8x1xi32, #tpu.memory_space<vmem>>, vector<8x1xi32>
    %197 = vector.broadcast %196 : vector<8x1xi32> to vector<8x128xi32>
    %198 = arith.cmpi eq, %193, %197 : vector<8x128xi32>
    %199 = arith.extui %198 : vector<8x128xi1> to vector<8x128xi32>
    %200 = arith.sitofp %199 : vector<8x128xi32> to vector<8x128xf32>
    %cst_100 = arith.constant 0xFF800000 : f32
    %201 = vector.broadcast %cst_100 : f32 to vector<8x128xf32>
    %202 = arith.select %195, %192, %201 : vector<8x128xi1>, vector<8x128xf32>
    %cst_101 = arith.constant dense<0xFF800000> : vector<8xf32>
    %203 = vector.multi_reduction <maximumf>, %202, %cst_101 [1] : vector<8x128xf32> to vector<8xf32>
    %204 = vector.shape_cast %203 : vector<8xf32> to vector<8x1xf32>
    %205 = vector.broadcast %204 : vector<8x1xf32> to vector<8x128xf32>
    %206 = arith.subf %192, %205 : vector<8x128xf32>
    %207 = math.exp %206 : vector<8x128xf32>
    %cst_102 = arith.constant 0.000000e+00 : f32
    %208 = vector.broadcast %cst_102 : f32 to vector<8x128xf32>
    %209 = arith.select %195, %207, %208 : vector<8x128xi1>, vector<8x128xf32>
    %cst_103 = arith.constant dense<0.000000e+00> : vector<8xf32>
    %210 = vector.multi_reduction <add>, %209, %cst_103 [1] : vector<8x128xf32> to vector<8xf32>
    %211 = vector.shape_cast %210 : vector<8xf32> to vector<8x1xf32>
    %212 = math.log %211 : vector<8x1xf32>
    %213 = arith.addf %204, %212 : vector<8x1xf32>
    %214 = arith.mulf %192, %200 : vector<8x128xf32>
    %cst_104 = arith.constant dense<0.000000e+00> : vector<8xf32>
    %215 = vector.multi_reduction <add>, %214, %cst_104 [1] : vector<8x128xf32> to vector<8xf32>
    %216 = vector.shape_cast %215 : vector<8xf32> to vector<8x1xf32>
    %217 = arith.subf %213, %216 : vector<8x1xf32>
    %cst_105 = arith.constant 0.000000e+00 : f32
    %218 = vector.broadcast %cst_105 : f32 to vector<8x1xf32>
    %219 = arith.select %5, %217, %218 : vector<8x1xi1>, vector<8x1xf32>
    %220 = vector.shape_cast %219 : vector<8x1xf32> to vector<1x8x1xf32>
    %cst_106 = arith.constant dense<0.000000e+00> : vector<1xf32>
    %221 = vector.multi_reduction <add>, %220, %cst_106 [1, 2] : vector<1x8x1xf32> to vector<1xf32>
    %222 = vector.shape_cast %221 : vector<1xf32> to vector<1x1x1xf32>
    %223 = vector.extract %222[0, 0, 0] : f32 from vector<1x1x1xf32>
    %c2 = arith.constant 2 : index
    %c0_107 = arith.constant 0 : index
    %c0_108 = arith.constant 0 : index
    %224 = vector.load %arg16[%c2, %c0_107, %c0_108] : memref<3x8x128xf32, #tpu.memory_space<vmem>>, vector<1x8x128xf32>
    %225 = vector.shape_cast %224 : vector<1x8x128xf32> to vector<8x128xf32>
    %226 = vector.shape_cast %192 : vector<8x128xf32> to vector<1x8x128xf32>
    tpu.vector_store %arg16[%c2, %c0_107, %c0_108], %226 {strides = array<i32>} : memref<3x8x128xf32, #tpu.memory_space<vmem>>, vector<1x8x128xf32>,
    %227 = tpu.iota {dimensions = array<i32: 0>} : vector<8x128xi32>
    %228 = tpu.iota {dimensions = array<i32: 1>} : vector<8x128xi32>
    %cst_109 = arith.constant 0.000000e+00 : f32
    %229 = vector.broadcast %cst_109 : f32 to vector<8x128xf32>
    %c0_i32 = arith.constant 0 : i32
    %230 = vector.broadcast %c0_i32 : i32 to vector<8x128xi32>
    %231 = arith.cmpi eq, %227, %230 : vector<8x128xi32>
    %c0_i32_110 = arith.constant 0 : i32
    %232 = vector.broadcast %c0_i32_110 : i32 to vector<8x128xi32>
    %233 = arith.cmpi eq, %228, %232 : vector<8x128xi32>
    %234 = arith.andi %231, %233 : vector<8x128xi1>
    %cst_111 = arith.constant 0.000000e+00 : f32
    %235 = vector.broadcast %84 : f32 to vector<8x128xf32>
    %236 = vector.broadcast %cst_111 : f32 to vector<8x128xf32>
    %237 = arith.select %234, %235, %236 : vector<8x128xi1>, vector<8x128xf32>
    %238 = arith.addf %229, %237 : vector<8x128xf32>
    %c0_i32_112 = arith.constant 0 : i32
    %239 = vector.broadcast %c0_i32_112 : i32 to vector<8x128xi32>
    %240 = arith.cmpi eq, %227, %239 : vector<8x128xi32>
    %c1_i32 = arith.constant 1 : i32
    %241 = vector.broadcast %c1_i32 : i32 to vector<8x128xi32>
    %242 = arith.cmpi eq, %228, %241 : vector<8x128xi32>
    %243 = arith.andi %240, %242 : vector<8x128xi1>
    %cst_113 = arith.constant 0.000000e+00 : f32
    %244 = vector.broadcast %176 : f32 to vector<8x128xf32>
    %245 = vector.broadcast %cst_113 : f32 to vector<8x128xf32>
    %246 = arith.select %243, %244, %245 : vector<8x128xi1>, vector<8x128xf32>
    %247 = arith.addf %238, %246 : vector<8x128xf32>
    %c0_i32_114 = arith.constant 0 : i32
    %248 = vector.broadcast %c0_i32_114 : i32 to vector<8x128xi32>
    %249 = arith.cmpi eq, %227, %248 : vector<8x128xi32>
    %c2_i32 = arith.constant 2 : i32
    %250 = vector.broadcast %c2_i32 : i32 to vector<8x128xi32>
    %251 = arith.cmpi eq, %228, %250 : vector<8x128xi32>
    %252 = arith.andi %249, %251 : vector<8x128xi1>
    %cst_115 = arith.constant 0.000000e+00 : f32
    %253 = vector.broadcast %223 : f32 to vector<8x128xf32>
    %254 = vector.broadcast %cst_115 : f32 to vector<8x128xf32>
    %255 = arith.select %252, %253, %254 : vector<8x128xi1>, vector<8x128xf32>
    %256 = arith.addf %247, %255 : vector<8x128xf32>
    %c0_116 = arith.constant 0 : index
    %c0_117 = arith.constant 0 : index
    %c0_118 = arith.constant 0 : index
    %257 = vector.load %arg17[%c0_116, %c0_117, %c0_118] : memref<1x8x128xf32, #tpu.memory_space<vmem>>, vector<1x8x128xf32>
    %258 = vector.shape_cast %257 : vector<1x8x128xf32> to vector<8x128xf32>
    %259 = vector.shape_cast %256 : vector<8x128xf32> to vector<1x8x128xf32>
    tpu.vector_store %arg17[%c0_116, %c0_117, %c0_118], %259 {strides = array<i32>} : memref<1x8x128xf32, #tpu.memory_space<vmem>>, vector<1x8x128xf32>,
    return
  }
  func.func @transform_0(%arg0: i32) -> (i32, i32) {
    %c0_i32 = arith.constant 0 : i32
    %c0_i32_0 = arith.constant 0 : i32
    return %arg0, %c0_i32 : i32, i32
  }
  func.func @transform_1(%arg0: i32) -> (i32, i32) {
    %c0_i32 = arith.constant 0 : i32
    %c0_i32_0 = arith.constant 0 : i32
    return %arg0, %c0_i32 : i32, i32
  }
  func.func @transform_2(%arg0: i32) -> (i32, i32) {
    %c0_i32 = arith.constant 0 : i32
    %c0_i32_0 = arith.constant 0 : i32
    %c0_i32_1 = arith.constant 0 : i32
    return %c0_i32, %c0_i32_0 : i32, i32
  }
  func.func @transform_3(%arg0: i32) -> (i32, i32) {
    %c0_i32 = arith.constant 0 : i32
    %c0_i32_0 = arith.constant 0 : i32
    %c0_i32_1 = arith.constant 0 : i32
    return %c0_i32, %c0_i32_0 : i32, i32
  }
  func.func @transform_4(%arg0: i32) -> (i32, i32) {
    %c0_i32 = arith.constant 0 : i32
    %c0_i32_0 = arith.constant 0 : i32
    %c0_i32_1 = arith.constant 0 : i32
    return %c0_i32, %c0_i32_0 : i32, i32
  }
  func.func @transform_5(%arg0: i32) -> (i32, i32) {
    %c0_i32 = arith.constant 0 : i32
    %c0_i32_0 = arith.constant 0 : i32
    %c0_i32_1 = arith.constant 0 : i32
    return %c0_i32, %c0_i32_0 : i32, i32
  }
  func.func @transform_6(%arg0: i32) -> (i32, i32) {
    %c0_i32 = arith.constant 0 : i32
    %c0_i32_0 = arith.constant 0 : i32
    %c0_i32_1 = arith.constant 0 : i32
    return %c0_i32, %c0_i32_0 : i32, i32
  }
  func.func @transform_7(%arg0: i32) -> (i32, i32) {
    %c0_i32 = arith.constant 0 : i32
    %c0_i32_0 = arith.constant 0 : i32
    %c0_i32_1 = arith.constant 0 : i32
    return %c0_i32, %c0_i32_0 : i32, i32
  }
  func.func @transform_8(%arg0: i32) -> (i32, i32) {
    %c0_i32 = arith.constant 0 : i32
    %c0_i32_0 = arith.constant 0 : i32
    return %arg0, %c0_i32 : i32, i32
  }
  func.func @transform_9(%arg0: i32) -> (i32, i32) {
    %c0_i32 = arith.constant 0 : i32
    %c0_i32_0 = arith.constant 0 : i32
    %c0_i32_1 = arith.constant 0 : i32
    return %c0_i32, %c0_i32_0 : i32, i32
  }
  func.func @transform_10(%arg0: i32) -> (i32, i32) {
    %c0_i32 = arith.constant 0 : i32
    %c0_i32_0 = arith.constant 0 : i32
    %c0_i32_1 = arith.constant 0 : i32
    return %c0_i32, %c0_i32_0 : i32, i32
  }
  func.func @transform_11(%arg0: i32) -> (i32, i32) {
    %c0_i32 = arith.constant 0 : i32
    %c0_i32_0 = arith.constant 0 : i32
    %c0_i32_1 = arith.constant 0 : i32
    return %c0_i32, %c0_i32_0 : i32, i32
  }
  func.func @transform_12(%arg0: i32) -> (i32, i32) {
    %c0_i32 = arith.constant 0 : i32
    %c0_i32_0 = arith.constant 0 : i32
    %c0_i32_1 = arith.constant 0 : i32
    return %c0_i32, %c0_i32_0 : i32, i32
  }
  func.func @transform_13(%arg0: i32) -> (i32, i32) {
    %c0_i32 = arith.constant 0 : i32
    %c0_i32_0 = arith.constant 0 : i32
    %c0_i32_1 = arith.constant 0 : i32
    return %c0_i32, %c0_i32_0 : i32, i32
  }
  func.func @transform_14(%arg0: i32) -> (i32, i32) {
    %c0_i32 = arith.constant 0 : i32
    %c0_i32_0 = arith.constant 0 : i32
    %c0_i32_1 = arith.constant 0 : i32
    return %c0_i32, %c0_i32_0 : i32, i32
  }
  func.func @transform_15(%arg0: i32) -> (i32, i32, i32) {
    %c0_i32 = arith.constant 0 : i32
    %c0_i32_0 = arith.constant 0 : i32
    %c0_i32_1 = arith.constant 0 : i32
    return %c0_i32, %arg0, %c0_i32_0 : i32, i32, i32
  }
  func.func @transform_16(%arg0: i32) -> (i32, i32, i32) {
    %c0_i32 = arith.constant 0 : i32
    %c0_i32_0 = arith.constant 0 : i32
    %c0_i32_1 = arith.constant 0 : i32
    return %arg0, %c0_i32, %c0_i32_0 : i32, i32, i32
  }
}

</mosaic_0001>

<bundles_post_ra>
// kernel: qmf_forward.1
= control target key start
LH: loop header
LB: loop body
LE: loop exit
PB: predicated region body
PF: predicated region fallthrough
CT: control target
= control target key end

     0   :  { %s1880_s0 = inlined_call_operand.vmem [shape: s32[8,1], index: 0, kind: input, shape index: {}]   ;;  %s1881_s1 = inlined_call_operand.vmem [shape: bf16[8,32], index: 1, kind: input, shape index: {}]   ;;  %s1882_s2 = inlined_call_operand.vmem [shape: bf16[32,128], index: 2, kind: input, shape index: {}]   ;;  %s1883_s3 = inlined_call_operand.vmem [shape: f32[1,128], index: 3, kind: input, shape index: {}]   ;;  %s1884_s4 = inlined_call_operand.hbm [shape: bf16[128,256], index: 4, kind: input, shape index: {}]   ;;  %s1885_s5 = inlined_call_operand.vmem [shape: f32[1,256], index: 5, kind: input, shape index: {}]   ;;  %s1886_s6 = inlined_call_operand.hbm [shape: bf16[256,128], index: 6, kind: input, shape index: {}]   ;;  %s1887_s7 = inlined_call_operand.hbm [shape: f32[1,128], index: 7, kind: input, shape index: {}]   ;;  %s1888_s8 = inlined_call_operand.vmem [shape: bf16[8,48], index: 8, kind: input, shape index: {}]   ;;  %s1889_s9 = inlined_call_operand.vmem [shape: bf16[48,128], index: 9, kind: input, shape index: {}]   ;;  %s1890_s10 = inlined_call_operand.hbm [shape: f32[1,128], index: 10, kind: input, shape index: {}]   ;;  %s1891_s11 = inlined_call_operand.hbm [shape: bf16[128,256], index: 11, kind: input, shape index: {}]   ;;  %s1892_s12 = inlined_call_operand.vmem [shape: f32[1,256], index: 12, kind: input, shape index: {}]   ;;  %s1893_s13 = inlined_call_operand.hbm [shape: bf16[256,128], index: 13, kind: input, shape index: {}]   ;;  %s1894_s14 = inlined_call_operand.vmem [shape: f32[1,128], index: 14, kind: input, shape index: {}]   ;;  %s1895_s15 = inlined_call_operand.vmem [shape: f32[3,8,128], index: 15, kind: output, shape index: {0}]   ;;  %s1896_s16 = inlined_call_operand.vmem [shape: f32[1,8,128], index: 16, kind: output, shape index: {1}]  }
   0x1   :  { %1897 = sst [smem:[#allocation17_spill]] %s1880_s0 }
   0x2   :  { %1898 = sst [smem:[#allocation18_spill]] %s1896_s16 }
   0x3   :  { %22 = vsyncpa [#allocation4], 0 }
   0x4   :  { %23 = vsyncpa [#allocation6], 0 }
   0x5   :  { %24 = vsyncpa [#allocation9], 0 }
   0x6   :  { %25 = vsyncpa [#allocation12], 0  ;;  %s1574_s21 = smov [#allocation5]   ;;  %s1434_s25 = scalar_lea.hbm %s1886_s6, 2048 }
   0x7   :  { %s53_s22 = sshll.u32 %s1574_s21, 4  ;;  %p1435_p0 = scmp.ne.s32.totalorder %s1886_s6, %s1434_s25  ;;  %s54_s22 = int_to_ptr.vmem [resolvable:$true] %s53_s22 }
   0x8   :  { %p1438_p1 = scmp.lt.u32.totalorder %s1434_s25, %s1886_s6 }
   0xa   :  { %p1440_p2 = pnand %p1438_p1, %p1435_p0 }
   0xc   :  { %1443 = shalt.err (!%p1440_p2)
}
   0xd   :  { %s1444_s30 = scalar_lea.vmem %s54_s22, 2048  ;;  %p1449_p4 = scmp.lt.s32.totalorder %s54_s22, %s54_s22 }
   0xe   :  { %p1445_p3 = scmp.ne.s32.totalorder %s54_s22, %s1444_s30  ;;  %p1450_p5 = scmp.lt.s32.totalorder %s1444_s30, %s1444_s30 }
  0x10   :  { %p1451_p6 = por %p1450_p5, %p1449_p4 }
  0x12   :  { %p1452_p7 = pnand %p1451_p6, %p1445_p3 }
  0x14   :  { %1455 = shalt.err (!%p1452_p7)
}
  0x15   :  { %s1575_s0 = smov 64   ;;  %s1576_s17 = smov 4  }
  0x16   :  { %59 = dma.hbm_to_vmem [thread:$0]  %s1886_s6, 2048, %s54_s22, [#allocation6], %s1575_s0, %s1575_s0, %s1576_s17  }
  0x17   :  { %s1577_s20 = smov [#allocation8]   ;;  %s1578_s23 = smov [#allocation3]  }
  0x18   :  { %s80_s21 = sshll.u32 %s1577_s20, 4  ;;  %s39_s24 = sshll.u32 %s1578_s23, 4  ;;  %s81_s21 = int_to_ptr.vmem [resolvable:$true] %s80_s21  ;;  %s40_s24 = int_to_ptr.vmem [resolvable:$true] %s39_s24 }
  0x19   :  { %s1456_s27 = scalar_lea.hbm %s1890_s10, 16 }
  0x1a   :  { %p1457_p8 = scmp.ne.s32.totalorder %s1890_s10, %s1456_s27  ;;  %p1460_p9 = scmp.lt.u32.totalorder %s1456_s27, %s1890_s10 }
  0x1c   :  { %p1462_p10 = pnand %p1460_p9, %p1457_p8 }
  0x1e   :  { %1465 = shalt.err (!%p1462_p10)
}
  0x1f   :  { %s1466_s6 = scalar_lea.vmem %s81_s21, 16  ;;  %s1470_s22 = scalar_lea.vmem %s81_s21, 32 }
  0x20   :  { %p1467_p11 = scmp.ne.s32.totalorder %s81_s21, %s1466_s6  ;;  %p1471_p12 = scmp.lt.s32.totalorder %s81_s21, %s81_s21 }
  0x21   :  { %p1472_p13 = scmp.lt.s32.totalorder %s1470_s22, %s1466_s6 }
  0x23   :  { %p1473_p0 = por %p1472_p13, %p1471_p12 }
  0x25   :  { %p1474_p1 = pnand %p1473_p0, %p1467_p11 }
  0x27   :  { %1477 = shalt.err (!%p1474_p1)
}
  0x28   :  { %83 = dma.hbm_to_vmem [thread:$0]  %s1890_s10, 16, %s81_s21, [#allocation9]  }
  0x29   :  { %s1478_s16 = scalar_lea.hbm %s1884_s4, 2048 }
  0x2a   :  { %p1479_p2 = scmp.ne.s32.totalorder %s1884_s4, %s1478_s16  ;;  %p1482_p3 = scmp.lt.u32.totalorder %s1478_s16, %s1884_s4 }
  0x2c   :  { %p1484_p4 = pnand %p1482_p3, %p1479_p2 }
  0x2e   :  { %1487 = shalt.err (!%p1484_p4)
}
  0x2f   :  { %s1488_s29 = scalar_lea.vmem %s40_s24, 2048  ;;  %p1493_p6 = scmp.lt.s32.totalorder %s40_s24, %s40_s24 }
  0x30   :  { %p1489_p5 = scmp.ne.s32.totalorder %s40_s24, %s1488_s29  ;;  %p1494_p7 = scmp.lt.s32.totalorder %s1488_s29, %s1488_s29 }
  0x32   :  { %p1495_p8 = por %p1494_p7, %p1493_p6 }
  0x34   :  { %p1496_p9 = pnand %p1495_p8, %p1489_p5 }
  0x36   :  { %1499 = shalt.err (!%p1496_p9)
}
  0x37   :  { %s1579_s10 = smov 128   ;;  %s1580_s21 = smov 8  }
  0x38   :  { %45 = dma.hbm_to_vmem [thread:$0]  %s1884_s4, 2048, %s40_s24, [#allocation4], %s1579_s10, %s1579_s10, %s1580_s21  }
  0x39   :  { %s1581_s22 = smov [#allocation7]   ;;  %s1582_s19 = smov [#allocation10]  }
  0x3a   :  { %s66_s18 = sshll.u32 %s1581_s22, 4  ;;  %s89_s20 = sshll.u32 %s1582_s19, 4  ;;  %s67_s18 = int_to_ptr.vmem [resolvable:$true] %s66_s18  ;;  %s90_s20 = int_to_ptr.vmem [resolvable:$true] %s89_s20 }
  0x3b   :  { %s1500_s25 = scalar_lea.hbm %s1887_s7, 16 }
  0x3c   :  { %p1501_p10 = scmp.ne.s32.totalorder %s1887_s7, %s1500_s25  ;;  %p1504_p11 = scmp.lt.u32.totalorder %s1500_s25, %s1887_s7 }
  0x3e   :  { %p1506_p12 = pnand %p1504_p11, %p1501_p10 }
  0x40   :  { %1509 = shalt.err (!%p1506_p12)
}
  0x41   :  { %s1510_s4 = scalar_lea.vmem %s67_s18, 16  ;;  %s1514_s24 = scalar_lea.vmem %s67_s18, 32 }
  0x42   :  { %p1511_p13 = scmp.ne.s32.totalorder %s67_s18, %s1510_s4  ;;  %p1515_p0 = scmp.lt.s32.totalorder %s67_s18, %s67_s18 }
  0x43   :  { %p1516_p1 = scmp.lt.s32.totalorder %s1514_s24, %s1510_s4 }
  0x45   :  { %p1517_p2 = por %p1516_p1, %p1515_p0 }
  0x47   :  { %p1518_p3 = pnand %p1517_p2, %p1511_p13 }
  0x49   :  { %1521 = shalt.err (!%p1518_p3)
}
  0x4a   :  { %69 = dma.hbm_to_vmem [thread:$0]  %s1887_s7, 16, %s67_s18, [#allocation6]  }
  0x4b   :  { %s1522_s23 = scalar_lea.hbm %s1891_s11, 2048 }
  0x4c   :  { %p1523_p4 = scmp.ne.s32.totalorder %s1891_s11, %s1522_s23  ;;  %p1526_p5 = scmp.lt.u32.totalorder %s1522_s23, %s1891_s11 }
  0x4e   :  { %p1528_p6 = pnand %p1526_p5, %p1523_p4 }
  0x50   :  { %1531 = shalt.err (!%p1528_p6)
}
  0x51   :  { %s1532_s28 = scalar_lea.vmem %s90_s20, 2048  ;;  %p1537_p8 = scmp.lt.s32.totalorder %s90_s20, %s90_s20 }
  0x52   :  { %p1533_p7 = scmp.ne.s32.totalorder %s90_s20, %s1532_s28  ;;  %p1538_p9 = scmp.lt.s32.totalorder %s1532_s28, %s1532_s28 }
  0x54   :  { %p1539_p10 = por %p1538_p9, %p1537_p8 }
  0x56   :  { %p1540_p11 = pnand %p1539_p10, %p1533_p7 }
  0x58   :  { %1543 = shalt.err (!%p1540_p11)
}
  0x59   :  { %95 = dma.hbm_to_vmem [thread:$0]  %s1891_s11, 2048, %s90_s20, [#allocation9], %s1579_s10, %s1579_s10, %s1580_s21  }
  0x5a   :  { %s1583_s29 = smov [#allocation11]   ;;  %s1544_s6 = scalar_lea.hbm %s1893_s13, 2048 }
  0x5b   :  { %s103_s4 = sshll.u32 %s1583_s29, 4  ;;  %p1545_p12 = scmp.ne.s32.totalorder %s1893_s13, %s1544_s6  ;;  %s104_s4 = int_to_ptr.vmem [resolvable:$true] %s103_s4 }
  0x5c   :  { %p1548_p13 = scmp.lt.u32.totalorder %s1544_s6, %s1893_s13 }
  0x5e   :  { %p1550_p0 = pnand %p1548_p13, %p1545_p12 }
  0x60   :  { %1553 = shalt.err (!%p1550_p0)
}
  0x61   :  { %s1554_s25 = scalar_lea.vmem %s104_s4, 2048  ;;  %p1559_p2 = scmp.lt.s32.totalorder %s104_s4, %s104_s4 }
  0x62   :  { %p1555_p1 = scmp.ne.s32.totalorder %s104_s4, %s1554_s25  ;;  %p1560_p3 = scmp.lt.s32.totalorder %s1554_s25, %s1554_s25 }
  0x64   :  { %p1561_p4 = por %p1560_p3, %p1559_p2 }
  0x66   :  { %p1562_p5 = pnand %p1561_p4, %p1555_p1 }
  0x68   :  { %1565 = shalt.err (!%p1562_p5)
}
  0x69   :  { %109 = dma.hbm_to_vmem [thread:$0]  %s1893_s13, 2048, %s104_s4, [#allocation12], %s1575_s0, %s1575_s0, %s1576_s17  }
  0x6a   :  { %1566 = dma.done.wait [#allocation4], 2048  }
  0x6b   :  { %1567 = vsyncadd [#allocation4], 4294965248 }
  0x6c   :  { %1568 = dma.done.wait [#allocation6], 2064  }
  0x6d   :  { %1569 = vsyncadd [#allocation6], 4294965232 }
  0x6e   :  { %1570 = dma.done.wait [#allocation9], 2064  }
  0x6f   :  { %1571 = vsyncadd [#allocation9], 4294965232 }
  0x70   :  { %1572 = dma.done.wait [#allocation12], 2048  }
  0x71   :  { %1573 = vsyncadd [#allocation12], 4294965248  ;;  %v1584_v0 = vmov 0.0   ;;  %vm1585_vm0 = vmmov 0   ;;  %v1321_v1 = vld [vmem:[%s1882_s2] sm:$0xff]   ;;  %v1322_v2 = vld [vmem:[%s1882_s2 + $0x8] sm:$0xff]   ;;  %v132_v50 = vlaneseq }
  0x72   :  { %1282 = vmatprep.subr.bf16.mxu0 %v1584_v0  ;;  %1286 = vmatprep.mubr.msk.bf16.mxu0 %vm1585_vm0, %v1584_v0  ;;  %v1323_v3 = vld [vmem:[#allocation3 + $0x4] ss:$8 sps:$4 sm:$0xff]   ;;  %v1325_v4 = vld [vmem:[#allocation3] ss:$8 sps:$4 sm:$0xff]   ;;  %v1326_v5 = vld [vmem:[#allocation3 + $0x14] ss:$8 sps:$4 sm:$0xff]  }
  0x73   :  { %1283 = vmatpush3.bf16.msra.mxu0 %v1321_v1  ;;  %v138_v6 = vld [vmem:[%s1881_s1] sm:$0xf]  ;;  %316 = vmatprep.subr.bf16.mxu1 %v1323_v3  ;;  %vm162_vm1 = vcmask 261120   ;;  %v1328_v7 = vld [vmem:[#allocation3 + $0x10] ss:$8 sps:$4 sm:$0xff]   ;;  %v1586_v20 = vmov 0  }
  0x74   :  { %1284 = vmatprep.subr.bf16.mxu0 %v1584_v0  ;;  %317 = vmatpush1.bf16.msra.mxu1 %v1325_v4  ;;  %v1329_v8 = vld [vmem:[#allocation3 + $0x24] ss:$8 sps:$4 sm:$0xff]   ;;  %v1331_v9 = vld [vmem:[#allocation3 + $0x20] ss:$8 sps:$4 sm:$0xff]   ;;  %v1332_v10 = vld [vmem:[#allocation3 + $0x34] ss:$8 sps:$4 sm:$0xff]  }
  0x75   :  { %318 = vmatprep.subr.bf16.mxu1 %v1326_v5  ;;  %v1334_v11 = vld [vmem:[#allocation3 + $0x30] ss:$8 sps:$4 sm:$0xff]   ;;  %v1335_v12 = vld [vmem:[#allocation3 + $0x44] ss:$8 sps:$4 sm:$0xff]   ;;  %v1337_v13 = vld [vmem:[#allocation3 + $0x40] ss:$8 sps:$4 sm:$0xff]   ;;  %348 = vmatprep.mubr.bf16.mxu1 %v1586_v20 }
  0x76   :  { %v1338_v14 = vld [vmem:[#allocation3 + $0x54] ss:$8 sps:$4 sm:$0xff]   ;;  %v1340_v15 = vld [vmem:[#allocation3 + $0x50] ss:$8 sps:$4 sm:$0xff]   ;;  %v1341_v16 = vld [vmem:[#allocation3 + $0x64] ss:$8 sps:$4 sm:$0xff]   ;;  %1319 = vset.pattern.permute.xlu1 %v1586_v20  ;;  %1320 = vset.pattern.permute.xlu0 %v1586_v20 }
  0x77   :  { %1285 = vmatpush3.bf16.msra.mxu0 %v1322_v2  ;;  %v1343_v17 = vld [vmem:[#allocation3 + $0x60] ss:$8 sps:$4 sm:$0xff]   ;;  %v1344_v18 = vld [vmem:[#allocation3 + $0x74] ss:$8 sps:$4 sm:$0xff]   ;;  %v1346_v19 = vld [vmem:[#allocation3 + $0x70] ss:$8 sps:$4 sm:$0xff]  }
  0x78   :  { %319 = vmatpush1.bf16.msra.mxu1 %v1328_v7  ;;  %v1350_v21 = vld [vmem:[#allocation5 + $0x40] sm:$0xff]   ;;  %v1352_v23 = vld [vmem:[#allocation5 + $0x48] sm:$0xff]   ;;  %v1354_v25 = vld [vmem:[#allocation5 + $0x50] sm:$0xff]   ;;  %vm642_vm2 = vcmask 392192   ;;  %v1793_v51 = vshrl.u32 %v132_v50, 7  ;;  %s1899_s16 = sld [smem:[#allocation17_spill]] }
  0x79   :  { %320 = vmatprep.subr.bf16.mxu1 %v1329_v8  ;;  %v1351_v22 = vld [vmem:[#allocation5] sm:$0xff]   ;;  %1234 = vmatprep.subr.bf16.mxu0 %v1350_v21  ;;  %v1353_v24 = vld [vmem:[#allocation5 + $0x8] sm:$0xff]   ;;  %v1355_v26 = vld [vmem:[#allocation5 + $0x10] sm:$0xff]   ;;  %vm591_vm14 = vcmask 7168   ;;  %s1900_s26 = sld [smem:[#allocation18_spill]] }
  0x7a   :  { %1287 = vmatmul.mubr.msk.bf16.vlgmr.msra.gmra.mrb[0].mxu0 %vm162_vm1, %v138_v6  ;;  %v1356_v27 = vld [vmem:[#allocation5 + $0x58] sm:$0xff]   ;;  %v1358_v29 = vld [vmem:[#allocation5 + $0x60] sm:$0xff]   ;;  %v1360_v31 = vld [vmem:[#allocation5 + $0x68] sm:$0xff]   ;;  %v228_v52 = vsub.s32 0, %v1793_v51  ;;  %v232_v54 = vsub.s32 1, %v1793_v51 }
  0x7b   :  { %1235 = vmatpush3.bf16.msra.mxu0 %v1351_v22  ;;  %v1357_v28 = vld [vmem:[#allocation5 + $0x18] sm:$0xff]   ;;  %v1359_v30 = vld [vmem:[#allocation5 + $0x20] sm:$0xff]   ;;  %v1361_v32 = vld [vmem:[#allocation5 + $0x28] sm:$0xff]  }
  0x7c   :  { %321 = vmatpush1.bf16.msra.mxu1 %v1331_v9  ;;  %1236 = vmatprep.subr.bf16.mxu0 %v1352_v23  ;;  %v1151_v33 = vld [vmem:[%s1883_s3] ss:$0 sm:$0xff]  ;;  %v1348_v42 = vld [vmem:[%s1889_s9 + $0x8] sm:$0xff]   ;;  %v1349_v43 = vld [vmem:[%s1889_s9 + $0x10] sm:$0xff]  }
  0x7d   :  { %322 = vmatprep.subr.bf16.mxu1 %v1332_v10  ;;  %v1347_v40 = vld [vmem:[%s1889_s9] sm:$0xff]   ;;  %v1362_v45 = vld [vmem:[#allocation5 + $0x70] sm:$0xff]   ;;  %v1364_v47 = vld [vmem:[#allocation5 + $0x78] sm:$0xff]  }
  0x7e   :  { %v610_v44 = vld [vmem:[%s1888_s8] sm:$0xf]  ;;  %v1363_v46 = vld [vmem:[#allocation5 + $0x30] sm:$0xff]   ;;  %v1365_v48 = vld [vmem:[#allocation5 + $0x38] sm:$0xff]  }
  0x7f   :  { %1237 = vmatpush3.bf16.msra.mxu0 %v1353_v24  ;;  %v1368_v49 = vld [vmem:[#allocation10 + $0x4] ss:$8 sps:$4 sm:$0xff]   ;;  %v224_v53 = vld [vmem:[%s1885_s5] sm:$0x3]  ;;  %v1366_v3 = vld [vmem:[#allocation10] ss:$8 sps:$4 sm:$0xff]  }
  0x80   :  { %323 = vmatpush1.bf16.msra.mxu1 %v1334_v11  ;;  %1238 = vmatprep.subr.bf16.mxu0 %v1354_v25  ;;  %v229_v55 = vrot.slane %v224_v53, %v228_v52  ;;  %v233_v56 = vrot.slane %v224_v53, %v232_v54  ;;  %v1371_v5 = vld [vmem:[#allocation10 + $0x14] ss:$8 sps:$4 sm:$0xff]   ;;  %v1369_v6 = vld [vmem:[#allocation10 + $0x10] ss:$8 sps:$4 sm:$0xff]   ;;  %v1374_v7 = vld [vmem:[#allocation10 + $0x24] ss:$8 sps:$4 sm:$0xff]  }
  0x81   :  { %324 = vmatprep.subr.bf16.mxu1 %v1335_v12  ;;  %v1372_v10 = vld [vmem:[#allocation10 + $0x20] ss:$8 sps:$4 sm:$0xff]   ;;  %v1377_v12 = vld [vmem:[#allocation10 + $0x34] ss:$8 sps:$4 sm:$0xff]   ;;  %v1387_v25 = vld [vmem:[#allocation10 + $0x70] ss:$8 sps:$4 sm:$0xff]  }
  0x82   :  { %v1384_v22 = vld [vmem:[#allocation10 + $0x60] ss:$8 sps:$4 sm:$0xff]   ;;  %v1389_v23 = vld [vmem:[#allocation10 + $0x74] ss:$8 sps:$4 sm:$0xff]  }
  0x83   :  { %1239 = vmatpush3.bf16.msra.mxu0 %v1355_v26 }
  0x84   :  { %325 = vmatpush1.bf16.msra.mxu1 %v1337_v13  ;;  %1240 = vmatprep.subr.bf16.mxu0 %v1356_v27  ;;  %v1390_v27 = vld [vmem:[#allocation11 + $0x40] sm:$0xff]  }
  0x85   :  { %326 = vmatprep.subr.bf16.mxu1 %v1338_v14  ;;  %v1375_v14 = vld [vmem:[#allocation10 + $0x30] ss:$8 sps:$4 sm:$0xff]  }
  0x87   :  { %1241 = vmatpush3.bf16.msra.mxu0 %v1357_v28  ;;  %v1391_v28 = vld [vmem:[#allocation11] sm:$0xff]  }
  0x88   :  { %327 = vmatpush1.bf16.msra.mxu1 %v1340_v15  ;;  %1242 = vmatprep.subr.bf16.mxu0 %v1358_v29  ;;  %v1380_v15 = vld [vmem:[#allocation10 + $0x44] ss:$8 sps:$4 sm:$0xff]  }
  0x89   :  { %328 = vmatprep.subr.bf16.mxu1 %v1341_v16  ;;  %v1378_v16 = vld [vmem:[#allocation10 + $0x40] ss:$8 sps:$4 sm:$0xff]  }
  0x8a   :  { %v1392_v29 = vld [vmem:[#allocation11 + $0x48] sm:$0xff]  }
  0x8b   :  { %1243 = vmatpush3.bf16.msra.mxu0 %v1359_v30  ;;  %v1393_v30 = vld [vmem:[#allocation11 + $0x8] sm:$0xff]  }
  0x8c   :  { %329 = vmatpush1.bf16.msra.mxu1 %v1343_v17  ;;  %1244 = vmatprep.subr.bf16.mxu0 %v1360_v31  ;;  %v1383_v17 = vld [vmem:[#allocation10 + $0x54] ss:$8 sps:$4 sm:$0xff]  }
  0x8d   :  { %330 = vmatprep.subr.bf16.mxu1 %v1344_v18  ;;  %v1381_v18 = vld [vmem:[#allocation10 + $0x50] ss:$8 sps:$4 sm:$0xff]  }
  0x8e   :  { %v1394_v31 = vld [vmem:[#allocation11 + $0x50] sm:$0xff]  }
  0x8f   :  { %1245 = vmatpush3.bf16.msra.mxu0 %v1361_v32  ;;  %v1395_v32 = vld [vmem:[#allocation11 + $0x10] sm:$0xff]  }
  0x90   :  { %331 = vmatpush1.bf16.msra.mxu1 %v1346_v19  ;;  %1246 = vmatprep.subr.bf16.mxu0 %v1362_v45  ;;  %v1189_v19 = vld [vmem:[#allocation8] ss:$0 sm:$0xff] }
  0x91   :  { %1290 = vmatprep.subr.bf16.mxu1 %v1584_v0 }
  0x93   :  { %1247 = vmatpush3.bf16.msra.mxu0 %v1363_v46 }
  0x94   :  { %1248 = vmatprep.subr.bf16.mxu0 %v1364_v47 }
  0x97   :  { %1249 = vmatpush3.bf16.msra.mxu0 %v1365_v48 }
  0x98   :  { %796 = vmatprep.subr.bf16.mxu0 %v1368_v49 }
 0x14d   :  { %v200_v34 = vpop.f32.mrb[0].mxu0 }
 0x14e   :  { %v201_v35 = vadd.f32 %v1151_v33, %v200_v34  ;;  %v1288_v36 = vpop.f32.mrb[1].mxu0  ;;  %v1396_v33 = vld [vmem:[#allocation11 + $0x58] sm:$0xff]  }
 0x14f   :  { %v203_v37 = vpop.f32.mrb[2].mxu0  ;;  %v1397_v34 = vld [vmem:[#allocation11 + $0x18] sm:$0xff]   ;;  %v1399_v36 = vld [vmem:[#allocation11 + $0x20] sm:$0xff]  }
 0x150   :  { %v206_v38 = vmax.f32 %v201_v35, 0.0  ;;  %v1289_v39 = vpop.f32.mrb[3].mxu0  ;;  %v1398_v35 = vld [vmem:[#allocation11 + $0x60] sm:$0xff]   ;;  %v1400_v37 = vld [vmem:[#allocation11 + $0x68] sm:$0xff]  }
 0x151   :  { %v1402_v39 = vld [vmem:[#allocation11 + $0x70] sm:$0xff]  }
 0x152   :  { %v207_v41 = vpack.c.bf16 %v206_v38, %v206_v38  ;;  %v1401_v38 = vld [vmem:[#allocation11 + $0x28] sm:$0xff]  }
 0x154   :  { %349 = vmatmul.mubr.bf16.vlgmr.msra.gmra.mrb[0].mxu1 %v207_v41  ;;  %v1404_v41 = vld [vmem:[#allocation11 + $0x78] sm:$0xff]  }
 0x155   :  { %1291 = vmatpush3.bf16.msra.mxu1 %v1347_v40  ;;  %1296 = vmatprep.mubr.msk.bf16.mxu1 %vm1585_vm0, %v1584_v0  ;;  %v1403_v40 = vld [vmem:[#allocation11 + $0x30] sm:$0xff]   ;;  %vm1122_vm0 = vcmp.eq.s32.totalorder %v1793_v51, 0 }
 0x156   :  { %1292 = vmatprep.subr.bf16.mxu1 %v1584_v0 }
 0x159   :  { %1293 = vmatpush3.bf16.msra.mxu1 %v1348_v42  ;;  %v1405_v42 = vld [vmem:[#allocation11 + $0x38] sm:$0xff]  }
 0x15a   :  { %1294 = vmatprep.subr.bf16.mxu1 %v1584_v0 }
 0x15d   :  { %1295 = vmatpush3.bf16.msra.mxu1 %v1349_v43 }
 0x15e   :  { %1260 = vmatprep.subr.bf16.mxu1 %v1390_v27 }
 0x160   :  { %1297 = vmatmul.mubr.msk.bf16.vlgmr.msra.gmra.mrb[4].mxu1 %vm642_vm2, %v610_v44  ;;  %v1171_v44 = vld [vmem:[#allocation7] ss:$0 sm:$0xff] }
 0x161   :  { %1261 = vmatpush3.bf16.msra.mxu1 %v1391_v28 }
 0x162   :  { %1262 = vmatprep.subr.bf16.mxu1 %v1392_v29  ;;  %v1210_v29 = vld [vmem:[%s1894_s14] ss:$0 sm:$0xff] }
 0x165   :  { %1263 = vmatpush3.bf16.msra.mxu1 %v1393_v30 }
 0x166   :  { %1264 = vmatprep.subr.bf16.mxu1 %v1394_v31 }
 0x169   :  { %1265 = vmatpush3.bf16.msra.mxu1 %v1395_v32 }
 0x16a   :  { %1266 = vmatprep.subr.bf16.mxu1 %v1396_v33 }
 0x16d   :  { %1267 = vmatpush3.bf16.msra.mxu1 %v1397_v34 }
 0x16e   :  { %1268 = vmatprep.subr.bf16.mxu1 %v1398_v35 }
 0x171   :  { %1269 = vmatpush3.bf16.msra.mxu1 %v1399_v36 }
 0x172   :  { %1270 = vmatprep.subr.bf16.mxu1 %v1400_v37 }
 0x175   :  { %1271 = vmatpush3.bf16.msra.mxu1 %v1401_v38 }
 0x176   :  { %1272 = vmatprep.subr.bf16.mxu1 %v1402_v39 }
 0x179   :  { %1273 = vmatpush3.bf16.msra.mxu1 %v1403_v40 }
 0x17a   :  { %1274 = vmatprep.subr.bf16.mxu1 %v1404_v41 }
 0x17d   :  { %1275 = vmatpush3.bf16.msra.mxu1 %v1405_v42 }
 0x227   :  { %v350_v57 = vpop.f32.mrb[0].mxu1 }
 0x228   :  { %v351_v58 = vadd.f32 %v350_v57, %v229_v55  ;;  %v352_v59 = vpop.f32.mrb[1].mxu1 }
 0x229   :  { %v353_v60 = vadd.f32 %v352_v59, %v233_v56  ;;  %v354_v61 = vpop.f32.mrb[2].mxu1 }
 0x22a   :  { %v357_v62 = vmax.f32 %v351_v58, 0.0  ;;  %v355_v63 = vpop.f32.mrb[3].mxu1  ;;  %v704_v58 = vld [vmem:[%s1892_s12] sm:$0x3] }
 0x22b   :  { %v358_v1 = vmax.f32 %v353_v60, 0.0  ;;  %v709_v60 = vrot.slane %v704_v58, %v228_v52  ;;  %v713_v61 = vrot.slane %v704_v58, %v232_v54  ;;  %v1813_v63 = vand.u32 127, %v132_v50 }
 0x22c   :  { %v359_v4 = vpack.c.bf16 %v357_v62, %v357_v62 }
 0x22d   :  { %v360_v2 = vpack.c.bf16 %v358_v1, %v358_v1  ;;  %vm538_vm3 = vcmp.lt.s32.totalorder %v1813_v63, 8  ;;  %vm606_vm7 = vcmp.eq.s32.totalorder %v1813_v63, 8  ;;  %vm1128_vm15 = vcmp.eq.s32.totalorder %v1813_v63, 1 }
 0x22e   :  { %vm1123_vm1 = vcmp.eq.s32.totalorder %v1813_v63, 0  ;;  %vm1129_vm2 = vmand %vm1122_vm0, %vm1128_vm15 }
 0x22f   :  { %528 = vmatprep.mubr.bf16.mxu0 %v360_v2 }
 0x230   :  { %529 = vmatmul.mubr.bf16.vlgmr.msra.gmra.mrb[4].mxu0 %v359_v4 }
 0x231   :  { %797 = vmatpush1.bf16.msra.mxu0 %v1366_v3  ;;  %828 = vmatprep.mubr.bf16.mxu0 %v1586_v20  ;;  %v1386_v20 = vld [vmem:[#allocation10 + $0x64] ss:$8 sps:$4 sm:$0xff]  }
 0x232   :  { %798 = vmatprep.subr.bf16.mxu0 %v1371_v5 }
 0x233   :  { %v680_v8 = vpop.f32.mrb[4].mxu1 }
 0x234   :  { %v1298_v9 = vpop.f32.mrb[5].mxu1  ;;  %v681_v21 = vadd.f32 %v1189_v19, %v680_v8 }
 0x235   :  { %799 = vmatpush1.bf16.msra.mxu0 %v1369_v6  ;;  %v683_v11 = vpop.f32.mrb[6].mxu1 }
 0x236   :  { %800 = vmatprep.subr.bf16.mxu0 %v1374_v7  ;;  %v1299_v13 = vpop.f32.mrb[7].mxu1  ;;  %v686_v24 = vmax.f32 %v681_v21, 0.0 }
 0x238   :  { %v687_v26 = vpack.c.bf16 %v686_v24, %v686_v24 }
 0x239   :  { %801 = vmatpush1.bf16.msra.mxu0 %v1372_v10 }
 0x23a   :  { %802 = vmatprep.subr.bf16.mxu0 %v1377_v12 }
 0x23d   :  { %803 = vmatpush1.bf16.msra.mxu0 %v1375_v14 }
 0x23e   :  { %804 = vmatprep.subr.bf16.mxu0 %v1380_v15 }
 0x241   :  { %805 = vmatpush1.bf16.msra.mxu0 %v1378_v16 }
 0x242   :  { %806 = vmatprep.subr.bf16.mxu0 %v1383_v17 }
 0x245   :  { %807 = vmatpush1.bf16.msra.mxu0 %v1381_v18 }
 0x246   :  { %808 = vmatprep.subr.bf16.mxu0 %v1386_v20 }
 0x249   :  { %809 = vmatpush1.bf16.msra.mxu0 %v1384_v22 }
 0x24a   :  { %810 = vmatprep.subr.bf16.mxu0 %v1389_v23 }
 0x24d   :  { %811 = vmatpush1.bf16.msra.mxu0 %v1387_v25 }
 0x250   :  { %829 = vmatmul.mubr.bf16.vlgmr.msra.gmra.mrb[8].mxu0 %v687_v26 }
 0x303   :  { %v1250_v43 = vpop.f32.mrb[4].mxu0 }
 0x304   :  { %v1251_v45 = vpop.f32.mrb[5].mxu0 }
 0x305   :  { %v1252_v46 = vadd.f32 %v1251_v45, %v1250_v43  ;;  %v1253_v47 = vpop.f32.mrb[6].mxu0 }
 0x306   :  { %v1254_v48 = vpop.f32.mrb[7].mxu0 }
 0x307   :  { %v531_v49 = vadd.f32 %v1252_v46, %v1171_v44 }
 0x309   :  { %v547_v53 = vmin.f32 %v531_v49, 20.0  ;;  %vm546_vm5 = vcmp.gt.f32.partialorder %v531_v49, 20.0 }
 0x30b   :  { %v548_v55 = vmul.f32 1.442695, %v547_v53 }
 0x30d   :  { %1406 = vpow2.f32 %v548_v55 }
 0x317   :  { %v1407_v56 = vpop.eup %1406 }
 0x318   :  { %v550_v57 = vadd.f32 1.0, %v1407_v56  ;;  %v553_v59 = vmul.f32 -0.5, %v1407_v56  ;;  %v556_v1 = vand.u32 2147483647, %v1407_v56 }
 0x31a   :  { %1408 = vlog2.f32 %v550_v57  ;;  %v554_v62 = vadd.f32 1.0, %v553_v59  ;;  %vm557_vm4 = vcmp.lt.f32.partialorder %v556_v1, 0.0004427343 }
 0x31c   :  { %v555_v9 = vmul.f32 %v1407_v56, %v554_v62  ;;  %v539_v56 = vld [vmem:[%s1899_s16] sm:$0xff] }
 0x323   :  { %v830_v2 = vpop.f32.mrb[8].mxu0 }
 0x324   :  { %v1409_v3 = vpop.eup %1408  ;;  %v831_v4 = vadd.f32 %v830_v2, %v709_v60  ;;  %v832_v5 = vpop.f32.mrb[9].mxu0 }
 0x325   :  { %v833_v6 = vadd.f32 %v832_v5, %v713_v61  ;;  %v834_v7 = vpop.f32.mrb[10].mxu0  ;;  %v552_v8 = vmul.f32 0.6931472, %v1409_v3 }
 0x326   :  { %v837_v10 = vmax.f32 %v831_v4, 0.0  ;;  %v835_v11 = vpop.f32.mrb[11].mxu0 }
 0x327   :  { %v838_v52 = vmax.f32 %v833_v6, 0.0  ;;  %v558_v54 = vsel %vm557_vm4, %v555_v9, %v552_v8  ;;  %vm1124_vm4 = vmand %vm1122_vm0, %vm1123_vm1 }
 0x328   :  { %v559_v12 = vsel %vm546_vm5, %v531_v49, %v558_v54  ;;  %v839_v15 = vpack.c.bf16 %v837_v10, %v837_v10 }
 0x329   :  { %v840_v50 = vpack.c.bf16 %v838_v52, %v838_v52  ;;  %v574_v13 = vsel %vm538_vm3, %v559_v12, -inf  ;;  %v1820_v14 = vsel %vm538_vm3, %v559_v12, 0.0 }
 0x32a   :  { %575 = vmax.xlane.f32.xlu1 %v574_v13  ;;  %v561_v16 = vmul.f32 1.442695, %v1820_v14 }
 0x32b   :  { %1008 = vmatprep.mubr.bf16.mxu1 %v840_v50 }
 0x32c   :  { %1009 = vmatmul.mubr.bf16.vlgmr.msra.gmra.mrb[8].mxu1 %v839_v15  ;;  %1410 = vpow2.f32 %v561_v16 }
 0x336   :  { %v1411_v17 = vpop.eup %1410 }
 0x337   :  { %v563_v18 = vadd.f32 0.001, %v1411_v17 }
 0x339   :  { %v564_v19 = vsel %vm538_vm3, %v563_v18, 0.0 }
 0x33a   :  { %565 = vadd.xlane.f32.xlu0 %v564_v19 }
 0x3b7   :  { %v1844_v58 = vpop.xlane.xlu1 %575 }
 0x3b8   :  { %v577_v59 = vsub.f32 %v1820_v14, %v1844_v58 }
 0x3ba   :  { %v578_v60 = vmul.f32 1.442695, %v577_v59 }
 0x3c7   :  { %v566_v20 = vpop.xlane.xlu0 %565 }
 0x3c8   :  { %1412 = vlog2.f32 %v566_v20 }
 0x3d2   :  { %v1413_v21 = vpop.eup %1412 }
 0x3d3   :  { %v568_v22 = vmul.f32 0.6931472, %v1413_v21 }
 0x3d5   :  { %v569_v23 = vand.u32 2147483647, %v568_v22 }
 0x3d7   :  { %vm570_vm6 = vcmp.eq.f32.partialorder %v569_v23, inf }
 0x3d8   :  { %v571_v24 = vsel %vm570_vm6, 0.0, %v568_v22 }
 0x3d9   :  { %v573_v25 = vmul.f32 0.1, %v571_v24 }
 0x3db   :  { %v607_v26 = vsel %vm606_vm7, %v573_v25, 0.0  ;;  %v603_v7 = vmul.f32 %v573_v25, %v1820_v14 }
 0x3dc   :  { %v608_v27 = vadd.f32 %v607_v26, %v1820_v14 }
 0x3de   :  { %609 = vst [vmem:[%s1895_s15] sm:$0xff] %v608_v27 }
 0x3ff   :  { %v1276_v28 = vpop.f32.mrb[8].mxu1 }
 0x400   :  { %v1277_v30 = vpop.f32.mrb[9].mxu1 }
 0x401   :  { %v1278_v31 = vadd.f32 %v1277_v30, %v1276_v28  ;;  %v1279_v32 = vpop.f32.mrb[10].mxu1 }
 0x402   :  { %v1280_v33 = vpop.f32.mrb[11].mxu1 }
 0x403   :  { %v1011_v34 = vadd.f32 %v1278_v31, %v1210_v29 }
 0x405   :  { %v1024_v35 = vmin.f32 %v1011_v34, 20.0  ;;  %vm1023_vm9 = vcmp.gt.f32.partialorder %v1011_v34, 20.0 }
 0x407   :  { %v1025_v36 = vmul.f32 1.442695, %v1024_v35 }
 0x409   :  { %1414 = vpow2.f32 %v1025_v36 }
 0x413   :  { %v1415_v37 = vpop.eup %1414 }
 0x414   :  { %v1027_v38 = vadd.f32 1.0, %v1415_v37  ;;  %v1030_v39 = vmul.f32 -0.5, %v1415_v37  ;;  %v1033_v41 = vand.u32 2147483647, %v1415_v37 }
 0x416   :  { %1416 = vlog2.f32 %v1027_v38  ;;  %v1031_v40 = vadd.f32 1.0, %v1030_v39  ;;  %vm1034_vm8 = vcmp.lt.f32.partialorder %v1033_v41, 0.0004427343 }
 0x418   :  { %v1032_v44 = vmul.f32 %v1415_v37, %v1031_v40 }
 0x420   :  { %v1417_v42 = vpop.eup %1416 }
 0x421   :  { %v1029_v43 = vmul.f32 0.6931472, %v1417_v42 }
 0x423   :  { %v1035_v45 = vsel %vm1034_vm8, %v1032_v44, %v1029_v43 }
 0x424   :  { %v1036_v46 = vsel %vm1023_vm9, %v1011_v34, %v1035_v45 }
 0x425   :  { %v1037_v47 = vsel %vm538_vm3, %v1036_v46, 0.0  ;;  %v1050_v48 = vsel %vm538_vm3, %v1036_v46, -inf }
 0x426   :  { %1051 = vmax.xlane.f32.xlu1 %v1050_v48  ;;  %v1038_v49 = vmul.f32 1.442695, %v1037_v47 }
 0x428   :  { %1418 = vpow2.f32 %v1038_v49 }
 0x429   :  { %1420 = vpow2.f32 %v578_v60 }
 0x432   :  { %v1419_v53 = vpop.eup %1418 }
 0x433   :  { %v1040_v55 = vadd.f32 0.001, %v1419_v53  ;;  %v1421_v61 = vpop.eup %1420 }
 0x434   :  { %v580_v62 = vsel %vm538_vm3, %v1421_v61, 0.0 }
 0x435   :  { %v1041_v57 = vsel %vm538_vm3, %v1040_v55, 0.0 }
 0x436   :  { %1042 = vadd.xlane.f32.xlu0 %v1041_v57 }
 0x437   :  { %541 = vperm.xlu1 %1319, %v539_v56  }
 0x43b   :  { %1088 = vperm.xlu1 %1319, %v539_v56  }
 0x45f   :  { %581 = vadd.xlane.f32.xlu1 %v580_v62 }
 0x4b3   :  { %v1052_v54 = vpop.xlane.xlu1 %1051 }
 0x4b4   :  { %v1053_v12 = vsub.f32 %v1037_v47, %v1052_v54 }
 0x4b6   :  { %v1054_v50 = vmul.f32 1.442695, %v1053_v12 }
 0x4b7   :  { %v542_v19 = vpop.permute.xlu1 %541 }
 0x4b8   :  { %vm543_vm11 = vcmp.eq.s32.totalorder %v1813_v63, %v542_v19 }
 0x4b9   :  { %v1188_v22 = vsel %vm543_vm11, 1.0, %v1584_v0 }
 0x4ba   :  { %v586_v25 = vmul.f32 %v1188_v22, %v1820_v14 }
 0x4bb   :  { %v1089_v24 = vpop.permute.xlu1 %1088 }
 0x4bc   :  { %vm1090_vm13 = vcmp.eq.s32.totalorder %v1813_v63, %v1089_v24 }
 0x4bd   :  { %v1229_v28 = vsel %vm1090_vm13, 1.0, %v1584_v0 }
 0x4c3   :  { %v1043_v1 = vpop.xlane.xlu0 %1042 }
 0x4c4   :  { %1422 = vlog2.f32 %v1043_v1 }
 0x4c5   :  { %1424 = vpow2.f32 %v1054_v50 }
 0x4ce   :  { %v1423_v2 = vpop.eup %1422 }
 0x4cf   :  { %v1045_v3 = vmul.f32 0.6931472, %v1423_v2  ;;  %v1425_v13 = vpop.eup %1424 }
 0x4d0   :  { %v1056_v15 = vsel %vm538_vm3, %v1425_v13, 0.0 }
 0x4d1   :  { %v1046_v4 = vand.u32 2147483647, %v1045_v3 }
 0x4d3   :  { %vm1047_vm10 = vcmp.eq.f32.partialorder %v1046_v4, inf }
 0x4d4   :  { %v1048_v5 = vsel %vm1047_vm10, 0.0, %v1045_v3 }
 0x4d5   :  { %v1049_v6 = vmul.f32 0.1, %v1048_v5 }
 0x4d7   :  { %v1078_v8 = vmul.f32 %v1049_v6, %v1037_v47  ;;  %v1081_v9 = vsel %vm606_vm7, %v1049_v6, 0.0 }
 0x4d8   :  { %v1082_v10 = vadd.f32 %v1081_v9, %v1037_v47 }
 0x4d9   :  { %v1079_v11 = vadd.f32 %v1078_v8, %v603_v7 }
 0x4da   :  { %1228 = vst [vmem:[%s1895_s15 + $0x8] sm:$0xff] %v1082_v10 }
 0x4db   :  { %v1093_v52 = vsel %vm538_vm3, %v1079_v11, -inf  ;;  %1230 = vst [vmem:[%s1895_s15 + $0x10] sm:$0xff] %v1079_v11  ;;  %v1105_v29 = vmul.f32 %v1229_v28, %v1079_v11 }
 0x4dc   :  { %1094 = vmax.xlane.f32.xlu0 %v1093_v52 }
 0x4ec   :  { %v582_v30 = vpop.xlane.xlu1 %581 }
 0x4f2   :  { %1018 = vperm.xlu0 %1320, %v539_v56  }
 0x511   :  { %1057 = vadd.xlane.f32.xlu0 %v1056_v15 }
 0x569   :  { %v1095_v16 = vpop.xlane.xlu0 %1094 }
 0x56a   :  { %v1096_v17 = vsub.f32 %v1079_v11, %v1095_v16 }
 0x56c   :  { %v1097_v18 = vmul.f32 1.442695, %v1096_v17 }
 0x56e   :  { %1426 = vpow2.f32 %v1097_v18 }
 0x56f   :  { %1428 = vlog2.f32 %v582_v30 }
 0x571   :  { %v1019_v20 = vpop.permute.xlu0 %1018 }
 0x572   :  { %vm1020_vm12 = vcmp.eq.s32.totalorder %v1813_v63, %v1019_v20 }
 0x573   :  { %v1227_v26 = vsel %vm1020_vm12, 1.0, %v1584_v0 }
 0x574   :  { %v1062_v27 = vmul.f32 %v1227_v26, %v1037_v47 }
 0x578   :  { %v1427_v21 = vpop.eup %1426 }
 0x579   :  { %v1099_v23 = vsel %vm538_vm3, %v1427_v21, 0.0  ;;  %v1429_v32 = vpop.eup %1428  ;;  %vm1133_vm3 = vcmp.eq.s32.totalorder %v1813_v63, 2 }
 0x57a   :  { %1100 = vadd.xlane.f32.xlu1 %v1099_v23  ;;  %v584_v33 = vmul.f32 0.6931472, %v1429_v32  ;;  %vm1134_vm5 = vmand %vm1122_vm0, %vm1133_vm3 }
 0x57c   :  { %v585_v36 = vadd.f32 %v584_v33, %v1844_v58 }
 0x57e   :  { %587 = vadd.xlane.f32.xlu1 %v586_v25 }
 0x582   :  { %1063 = vadd.xlane.f32.xlu1 %v1062_v27 }
 0x586   :  { %1106 = vadd.xlane.f32.xlu1 %v1105_v29 }
 0x59e   :  { %v1058_v31 = vpop.xlane.xlu0 %1057 }
 0x59f   :  { %1430 = vlog2.f32 %v1058_v31 }
 0x5a9   :  { %v1431_v34 = vpop.eup %1430 }
 0x5aa   :  { %v1060_v14 = vmul.f32 0.6931472, %v1431_v34 }
 0x5ac   :  { %v1061_v0 = vadd.f32 %v1060_v14, %v1052_v54 }
 0x607   :  { %v1101_v35 = vpop.xlane.xlu1 %1100 }
 0x608   :  { %1432 = vlog2.f32 %v1101_v35 }
 0x60b   :  { %v588_v37 = vpop.xlane.xlu1 %587 }
 0x60c   :  { %v589_v38 = vsub.f32 %v585_v36, %v588_v37 }
 0x60e   :  { %v592_v39 = vsel %vm591_vm14, %v589_v38, 0.0 }
 0x60f   :  { %593 = vadd.xlane.f32.xlu1 %v592_v39  ;;  %v1064_v40 = vpop.xlane.xlu1 %1063 }
 0x610   :  { %v1065_v41 = vsub.f32 %v1061_v0, %v1064_v40 }
 0x612   :  { %v1433_v42 = vpop.eup %1432  ;;  %v1067_v43 = vsel %vm591_vm14, %v1065_v41, 0.0 }
 0x613   :  { %v1103_v44 = vmul.f32 0.6931472, %v1433_v42  ;;  %1068 = vadd.xlane.f32.xlu1 %v1067_v43  ;;  %v1107_v46 = vpop.xlane.xlu1 %1106 }
 0x615   :  { %v1104_v45 = vadd.f32 %v1103_v44, %v1095_v16 }
 0x617   :  { %v1108_v47 = vsub.f32 %v1104_v45, %v1107_v46 }
 0x619   :  { %v1110_v48 = vsel %vm591_vm14, %v1108_v47, 0.0 }
 0x61a   :  { %1111 = vadd.xlane.f32.xlu0 %v1110_v48 }
 0x69c   :  { %v594_v49 = vpop.xlane.xlu1 %593 }
 0x69d   :  { %v595_v53 = vrot.slane %v594_v49, 4 }
 0x69f   :  { %v596_v55 = vadd.f32 %v595_v53, %v594_v49 }
 0x6a0   :  { %v1069_v56 = vpop.xlane.xlu1 %1068 }
 0x6a1   :  { %v597_v57 = vrot.slane %v596_v55, 2  ;;  %v1070_v58 = vrot.slane %v1069_v56, 4 }
 0x6a3   :  { %v1071_v59 = vadd.f32 %v1070_v58, %v1069_v56  ;;  %v598_v60 = vadd.f32 %v597_v57, %v596_v55 }
 0x6a5   :  { %v1072_v61 = vrot.slane %v1071_v59, 2  ;;  %v599_v62 = vrot.slane %v598_v60, 1 }
 0x6a7   :  { %v1073_v1 = vadd.f32 %v1072_v61, %v1071_v59  ;;  %v1112_v2 = vpop.xlane.xlu0 %1111  ;;  %v600_v3 = vadd.f32 %v599_v62, %v598_v60 }
 0x6a8   :  { %v1113_v4 = vrot.slane %v1112_v2, 4 }
 0x6a9   :  { %1300 = vpush %v600_v3  ;;  %v1074_v5 = vrot.slane %v1073_v1, 1 }
 0x6aa   :  { %v1114_v6 = vadd.f32 %v1113_v4, %v1112_v2 }
 0x6ab   :  { %v1075_v7 = vadd.f32 %v1074_v5, %v1073_v1 }
 0x6ac   :  { %v1115_v8 = vrot.slane %v1114_v6, 2 }
 0x6ad   :  { %1302 = vpush %v1075_v7 }
 0x6ae   :  { %v1116_v9 = vadd.f32 %v1115_v8, %v1114_v6 }
 0x6b0   :  { %v1117_v10 = vrot.slane %v1116_v9, 1 }
 0x6b2   :  { %v1118_v11 = vadd.f32 %v1117_v10, %v1116_v9 }
 0x6b4   :  { %1304 = vpush %v1118_v11 }
 0x6da   :  { %s1301_s15 = spop %1300 }
 0x6db   :  { %v1125_v54 = vstv %s1301_s15 }
 0x6dc   :  { %v1126_v50 = vsel %vm1124_vm4, %v1125_v54, 0.0 }
 0x6de   :  { %s1303_s20 = spop %1302 }
 0x6df   :  { %v1130_v52 = vstv %s1303_s20 }
 0x6e0   :  { %v1131_v12 = vsel %vm1129_vm2, %v1130_v52, 0.0 }
 0x6e1   :  { %v1132_v13 = vadd.f32 %v1131_v12, %v1126_v50 }
 0x6e5   :  { %s1305_s13 = spop %1304 }
 0x6e6   :  { %v1135_v15 = vstv %s1305_s13 }
 0x6e7   :  { %v1136_v16 = vsel %vm1134_vm5, %v1135_v15, 0.0 }
 0x6e8   :  { %v1137_v17 = vadd.f32 %v1136_v16, %v1132_v13 }
 0x6ea   :  { %1138 = vst [vmem:[%s1900_s26] sm:$0xff] %v1137_v17 }
 0x6eb   :  { %1147 = vsyncpa [#allocation4], 1 }
 0x6ec   :  { %1148 = vsyncpa [#allocation6], 1 }
 0x6ed   :  { %1149 = vsyncpa [#allocation9], 1 }
 0x6ee   :  { %1150 = vsyncpa [#allocation12], 1 }

</bundles_post_ra>
